<compile_context>
chip_gen: v7x
topology: tpu7x:2x2x1
jax: 0.10.0
libtpu: 0.0.40
codegen_flags: <defaults>
</compile_context>

<pallas_src>
import functools

import jax
import jax.numpy as jnp
from jax import lax
from jax.experimental import pallas as pl
from jax.experimental.pallas import tpu as pltpu


def _smooth_l1(d):
    ad = jnp.abs(d)
    return jnp.where(ad < 1.0, 0.5 * ad * ad, ad - 0.5)


def _ssd_loss_kernel(glabel_ref, gloc_ref, ploc_ref, plabel_ref, dbc_ref,
                     out_ref, mask_s, con_s, sl1m_s,
                     *, scale_wh, batch_block, num_anchors, num_classes):
    f32 = jnp.float32
    B, A, C = batch_block, num_anchors, num_classes

    # ---- constants hoisted out of the per-sample loop --------------------------
    cst = dbc_ref[0]               # (6, A): [sxy/db_wh (2), sxy*db_xy/db_wh (2), swh*log(db_wh) (2)]
    a_xy = cst[0:2, :]
    b_xy = cst[2:4, :]
    c_wh = cst[4:6, :]
    cls_iota = lax.broadcasted_iota(jnp.int32, (C, A), 0)

    # ---- phase 1: per-sample CE / SmoothL1, packed into (B, A) scratch ---------
    for b in range(B):
        g = glabel_ref[b]          # (1, A) int32
        gl = gloc_ref[b]           # (4, A)
        p = ploc_ref[b]            # (4, A)
        logits = plabel_ref[b]     # (C, A)

        maskf = (g > 0).astype(f32)                                   # (1, A)

        # localization target (_loc_vec) + SmoothL1 summed over the 4 coords
        # NOTE: log(gl_wh) is evaluated for all anchors (background included),
        # matching the reference module's behavior.
        gxy = gl[:2, :] * a_xy - b_xy                                 # (2, A)
        gwh = scale_wh * jnp.log(gl[2:, :]) - c_wh                    # (2, A)
        sl1 = (_smooth_l1(p[:2, :] - gxy).sum(axis=0, keepdims=True)
               + _smooth_l1(p[2:, :] - gwh).sum(axis=0, keepdims=True))  # (1, A)

        # per-anchor cross entropy (no reduction); con >= 0 always
        m = jnp.max(logits, axis=0, keepdims=True)                    # (1, A)
        lse = jnp.log(jnp.sum(jnp.exp(logits - m), axis=0, keepdims=True)) + m
        picked = jnp.sum(jnp.where(cls_iota == g, logits, 0.0),
                         axis=0, keepdims=True)                       # (1, A)
        con = lse - picked                                            # (1, A)

        row = pl.ds(b, 1)
        mask_s[row, :] = maskf
        con_s[row, :] = con
        sl1m_s[row, :] = maskf * sl1

    # ---- phase 2: batched hard negative mining on (B, A) -----------------------
    mask_all = mask_s[...]                                            # (B, A)
    con_all = con_s[...]                                              # (B, A)
    sl1m = sl1m_s[...]                                                # (B, A)

    # con_neg (positives zeroed) recomputed with one select; >= +0.0 everywhere,
    # so the int32 bit-pattern ordering equals the float ordering.
    con_neg = jnp.where(mask_all > 0.0, 0.0, con_all)                 # (B, A)
    bits = pltpu.bitcast(con_neg, jnp.int32)                          # (B, A)

    pos_num = jnp.sum(mask_all, axis=1, keepdims=True)                # (B, 1)
    K = jnp.minimum(3.0 * pos_num, f32(A))                            # (B, 1), integer-valued

    # K-th largest value per row via bit-wise counting bisection (exact):
    # T = max integer threshold with count(bits >= T) >= K.
    T = jnp.zeros((B, 1), jnp.int32)
    for bit in range(30, -1, -1):
        cand = T | jnp.int32(1 << bit)
        cnt = jnp.sum((bits >= cand).astype(f32), axis=1, keepdims=True)
        T = jnp.where(cnt >= K, cand, T)

    n_gt = jnp.sum((bits > T).astype(f32), axis=1, keepdims=True)     # strictly-greater count
    r = K - n_gt                                                      # ties to take (first by index)
    eq = bits == T                                                    # (B, A)

    # smallest index bound Jstar with count(eq & lane < Jstar) == r (stable tie-break)
    lane = lax.broadcasted_iota(jnp.int32, (B, A), 1)
    Jm = jnp.zeros((B, 1), jnp.int32)
    for bit in range(max(1, (A - 1).bit_length()) - 1, -1, -1):
        cand = Jm | jnp.int32(1 << bit)
        c = jnp.sum((eq & (lane < cand)).astype(f32), axis=1, keepdims=True)
        Jm = jnp.where(c < r, cand, Jm)
    Jstar = Jm + 1

    # exactly K anchors per row, identical to `stable-descending-rank < K`
    neg_mask = ((bits > T) | (eq & (lane < Jstar))).astype(f32)       # (B, A)

    closs = jnp.sum(con_all * (mask_all + neg_mask), axis=1, keepdims=True)   # (B, 1)
    sl1_sum = jnp.sum(sl1m, axis=1, keepdims=True)                            # (B, 1)

    total = sl1_sum + closs
    num_mask = (pos_num > 0).astype(f32)
    pos_c = jnp.maximum(pos_num, 1e-6)
    out_ref[0] = total * num_mask / pos_c                             # (B, 1) per-sample loss


def _vmem_estimate(B, C, A):
    # double-buffered inputs + packed scratch + transient (C,A)/(B,A) intermediates
    inputs = 2 * 4 * A * B * (1 + 4 + 4 + C) + 2 * 4 * A * 6
    scratch = 3 * 4 * A * B
    inter = 4 * A * (4 * C + 16 * B)
    return inputs + scratch + inter


def _pick_batch_block(N, C, A, budget=24 * 1024 * 1024):
    divisors = [d for d in range(1, min(N, 8) + 1) if N % d == 0]
    b = divisors[-1]
    while len(divisors) > 1 and _vmem_estimate(b, C, A) > budget:
        divisors.pop()
        b = divisors[-1]
    return b


def ssd_loss(ploc, plabel, gloc, glabel, dboxes, scale_xy, scale_wh):
    f32 = jnp.float32
    N, _, A = ploc.shape
    C = plabel.shape[1]

    glabel3 = glabel.reshape(N, 1, A).astype(jnp.int32)

    # precompute dboxes-derived constants (hoist divides/logs out of the kernel)
    db_xy = dboxes[:, :2, :].astype(f32)
    db_wh = dboxes[:, 2:, :].astype(f32)
    a_xy = scale_xy / db_wh
    b_xy = scale_xy * db_xy / db_wh
    c_wh = scale_wh * jnp.log(db_wh)
    db_const = jnp.concatenate([a_xy, b_xy, c_wh], axis=1)            # (1, 6, A)

    B = _pick_batch_block(N, C, A)
    n_blocks = N // B

    est = _vmem_estimate(B, C, A)
    vmem_limit = int(min(2 * est, 56 * 1024 * 1024)) if est > 12 * 1024 * 1024 else None

    kernel = functools.partial(
        _ssd_loss_kernel, scale_wh=float(scale_wh),
        batch_block=B, num_anchors=A, num_classes=C)

    out = pl.pallas_call(
        kernel,
        out_shape=jax.ShapeDtypeStruct((n_blocks, B, 1), f32),
        grid_spec=pltpu.PrefetchScalarGridSpec(
            num_scalar_prefetch=0,
            grid=(n_blocks,),
            in_specs=[
                pl.BlockSpec((B, 1, A), lambda i: (i, 0, 0)),   # glabel
                pl.BlockSpec((B, 4, A), lambda i: (i, 0, 0)),   # gloc
                pl.BlockSpec((B, 4, A), lambda i: (i, 0, 0)),   # ploc
                pl.BlockSpec((B, C, A), lambda i: (i, 0, 0)),   # plabel
                pl.BlockSpec((1, 6, A), lambda i: (0, 0, 0)),   # dbox constants (shared)
            ],
            out_specs=pl.BlockSpec((1, B, 1), lambda i: (i, 0, 0)),
            scratch_shapes=[
                pltpu.VMEM((B, A), f32),   # mask
                pltpu.VMEM((B, A), f32),   # con
                pltpu.VMEM((B, A), f32),   # mask * smooth_l1
            ],
        ),
        compiler_params=pltpu.CompilerParams(
            dimension_semantics=("parallel",),
            vmem_limit_bytes=vmem_limit),
    )(glabel3, gloc.astype(f32), ploc.astype(f32), plabel.astype(f32), db_const)

    # masked per-sample losses already normalized; batch mean done here (cheap XLA op)
    return jnp.mean(out)


def loss_ref(ploc, plabel, gloc, glabel, dboxes, scale_xy, scale_wh):
    """Pure-JAX reference mirroring the PyTorch module."""
    f32 = jnp.float32
    N, _, A = ploc.shape
    mask = glabel > 0
    pos_num = mask.sum(axis=1)

    gxy = scale_xy * (gloc[:, :2, :] - dboxes[:, :2, :]) / dboxes[:, 2:, :]
    gwh = scale_wh * jnp.log(gloc[:, 2:, :] / dboxes[:, 2:, :])
    vec_gd = jnp.concatenate([gxy, gwh], axis=1)

    sl1 = _smooth_l1(ploc - vec_gd).sum(axis=1)
    sl1 = (mask.astype(f32) * sl1).sum(axis=1)

    lse = jax.scipy.special.logsumexp(plabel, axis=1)                       # (N, A)
    picked = jnp.take_along_axis(plabel, glabel[:, None, :], axis=1)[:, 0]  # (N, A)
    con = lse - picked

    con_neg = jnp.where(mask, 0.0, con)
    con_idx = jnp.argsort(-con_neg, axis=1)     # stable descending
    con_rank = jnp.argsort(con_idx, axis=1)
    neg_num = jnp.minimum(3 * pos_num, A)[:, None]
    neg_mask = con_rank < neg_num

    closs = (con * (mask.astype(f32) + neg_mask.astype(f32))).sum(axis=1)
    total = sl1 + closs
    num_mask = (pos_num > 0).astype(f32)
    pos_c = jnp.maximum(pos_num.astype(f32), 1e-6)
    return jnp.mean(total * num_mask / pos_c)


if __name__ == "__main__":
    key = jax.random.PRNGKey(0)
    N, C, A = 2, 8, 256            # batch, num classes, num default boxes
    scale_xy = 1.0 / 0.1           # dboxes.scale_xy = 0.1
    scale_wh = 1.0 / 0.2           # dboxes.scale_wh = 0.2

    k1, k2, k3, k4, k5, k6, k7, k8 = jax.random.split(key, 8)

    # deterministic synthetic "default boxes" (xywh, positive w/h)
    dboxes = jnp.concatenate(
        [jax.random.uniform(k1, (1, 2, A), jnp.float32, 0.1, 0.9),
         jax.random.uniform(k2, (1, 2, A), jnp.float32, 0.1, 0.5)], axis=1)

    ploc = jax.random.normal(k3, (N, 4, A), jnp.float32)
    plabel = jax.random.normal(k4, (N, C, A), jnp.float32)
    gloc = jnp.concatenate(
        [jax.random.uniform(k5, (N, 2, A), jnp.float32, 0.1, 0.9),
         jax.random.uniform(k6, (N, 2, A), jnp.float32, 0.1, 0.5)], axis=1)

    # sparse positives (~15%) so hard-negative mining actually selects a subset
    raw_lbl = jax.random.randint(k7, (N, A), 1, C, dtype=jnp.int32)
    keep = jax.random.uniform(k8, (N, A)) < 0.15
    glabel = jnp.where(keep, raw_lbl, 0).astype(jnp.int32)

    out = jax.block_until_ready(
        ssd_loss(ploc, plabel, gloc, glabel, dboxes, scale_xy, scale_wh))
    ref = loss_ref(ploc, plabel, gloc, glabel, dboxes, scale_xy, scale_wh)

    assert jnp.isfinite(out), out
    assert jnp.allclose(out, ref, rtol=1e-3, atol=1e-3), (out, ref)
    print("KERNEL_OK")
</pallas_src>

<mosaic_0001>
module attributes {stable_mosaic.version = 11 : i64} {
  func.func @_ssd_loss_kernel(%arg0: i32, %arg1: memref<2x1x256xi32, #tpu.memory_space<vmem>>, %arg2: memref<2x4x256xf32, #tpu.memory_space<vmem>>, %arg3: memref<2x4x256xf32, #tpu.memory_space<vmem>>, %arg4: memref<2x8x256xf32, #tpu.memory_space<vmem>>, %arg5: memref<1x6x256xf32, #tpu.memory_space<vmem>>, %arg6: memref<1x2x1xf32, #tpu.memory_space<vmem>>, %arg7: memref<2x256xf32, #tpu.memory_space<vmem>>, %arg8: memref<2x256xf32, #tpu.memory_space<vmem>>, %arg9: memref<2x256xf32, #tpu.memory_space<vmem>>) attributes {dimension_semantics = [#tpu.dimension_semantics<parallel>], iteration_bounds = array<i64: 1>, scalar_prefetch = 0 : i64, scratch_operands = 3 : i64, tpu.core_type = #tpu.core_type<tc>, window_params = [{transform_indices = @transform_0, window_bounds = array<i64: 2, 1, 256>}, {transform_indices = @transform_1, window_bounds = array<i64: 2, 4, 256>}, {transform_indices = @transform_2, window_bounds = array<i64: 2, 4, 256>}, {transform_indices = @transform_3, window_bounds = array<i64: 2, 8, 256>}, {pipeline_mode = #tpu.pipeline_mode<synchronous>, transform_indices = @transform_4, window_bounds = array<i64: 1, 6, 256>}, {transform_indices = @transform_5, window_bounds = array<i64: 1, 2, 1>}]} {
    %c0 = arith.constant 0 : index
    %c0_0 = arith.constant 0 : index
    %c0_1 = arith.constant 0 : index
    %0 = vector.load %arg5[%c0, %c0_0, %c0_1] : memref<1x6x256xf32, #tpu.memory_space<vmem>>, vector<1x6x256xf32>
    %1 = vector.shape_cast %0 : vector<1x6x256xf32> to vector<6x256xf32>
    %2 = vector.extract_strided_slice %1 {offsets = [0, 0], sizes = [2, 256], strides = [1, 1]} : vector<6x256xf32> to vector<2x256xf32>
    %3 = vector.extract_strided_slice %1 {offsets = [2, 0], sizes = [2, 256], strides = [1, 1]} : vector<6x256xf32> to vector<2x256xf32>
    %4 = vector.extract_strided_slice %1 {offsets = [4, 0], sizes = [2, 256], strides = [1, 1]} : vector<6x256xf32> to vector<2x256xf32>
    %5 = tpu.iota {dimensions = array<i32: 0>} : vector<8x256xi32>
    %c0_2 = arith.constant 0 : index
    %c0_3 = arith.constant 0 : index
    %c0_4 = arith.constant 0 : index
    %6 = vector.load %arg1[%c0_2, %c0_3, %c0_4] : memref<2x1x256xi32, #tpu.memory_space<vmem>>, vector<1x1x256xi32>
    %7 = vector.shape_cast %6 : vector<1x1x256xi32> to vector<1x256xi32>
    %c0_5 = arith.constant 0 : index
    %c0_6 = arith.constant 0 : index
    %c0_7 = arith.constant 0 : index
    %8 = vector.load %arg2[%c0_5, %c0_6, %c0_7] : memref<2x4x256xf32, #tpu.memory_space<vmem>>, vector<1x4x256xf32>
    %9 = vector.shape_cast %8 : vector<1x4x256xf32> to vector<4x256xf32>
    %c0_8 = arith.constant 0 : index
    %c0_9 = arith.constant 0 : index
    %c0_10 = arith.constant 0 : index
    %10 = vector.load %arg3[%c0_8, %c0_9, %c0_10] : memref<2x4x256xf32, #tpu.memory_space<vmem>>, vector<1x4x256xf32>
    %11 = vector.shape_cast %10 : vector<1x4x256xf32> to vector<4x256xf32>
    %c0_11 = arith.constant 0 : index
    %c0_12 = arith.constant 0 : index
    %c0_13 = arith.constant 0 : index
    %12 = vector.load %arg4[%c0_11, %c0_12, %c0_13] : memref<2x8x256xf32, #tpu.memory_space<vmem>>, vector<1x8x256xf32>
    %13 = vector.shape_cast %12 : vector<1x8x256xf32> to vector<8x256xf32>
    %c0_i32 = arith.constant 0 : i32
    %14 = vector.broadcast %c0_i32 : i32 to vector<1x256xi32>
    %15 = arith.cmpi sgt, %7, %14 : vector<1x256xi32>
    %16 = arith.extui %15 : vector<1x256xi1> to vector<1x256xi32>
    %17 = arith.sitofp %16 : vector<1x256xi32> to vector<1x256xf32>
    %18 = vector.extract_strided_slice %9 {offsets = [0, 0], sizes = [2, 256], strides = [1, 1]} : vector<4x256xf32> to vector<2x256xf32>
    %19 = arith.mulf %18, %2 : vector<2x256xf32>
    %20 = arith.subf %19, %3 : vector<2x256xf32>
    %21 = vector.extract_strided_slice %9 {offsets = [2, 0], sizes = [2, 256], strides = [1, 1]} : vector<4x256xf32> to vector<2x256xf32>
    %22 = math.log %21 : vector<2x256xf32>
    %cst = arith.constant 5.000000e+00 : f32
    %23 = vector.broadcast %cst : f32 to vector<2x256xf32>
    %24 = arith.mulf %23, %22 : vector<2x256xf32>
    %25 = arith.subf %24, %4 : vector<2x256xf32>
    %26 = vector.extract_strided_slice %11 {offsets = [0, 0], sizes = [2, 256], strides = [1, 1]} : vector<4x256xf32> to vector<2x256xf32>
    %27 = arith.subf %26, %20 : vector<2x256xf32>
    %28 = math.absf %27 : vector<2x256xf32>
    %cst_14 = arith.constant 1.000000e+00 : f32
    %29 = vector.broadcast %cst_14 : f32 to vector<2x256xf32>
    %30 = arith.cmpf olt, %28, %29 : vector<2x256xf32>
    %cst_15 = arith.constant 5.000000e-01 : f32
    %31 = vector.broadcast %cst_15 : f32 to vector<2x256xf32>
    %32 = arith.mulf %31, %28 : vector<2x256xf32>
    %33 = arith.mulf %32, %28 : vector<2x256xf32>
    %cst_16 = arith.constant 5.000000e-01 : f32
    %34 = vector.broadcast %cst_16 : f32 to vector<2x256xf32>
    %35 = arith.subf %28, %34 : vector<2x256xf32>
    %36 = arith.select %30, %33, %35 : vector<2x256xi1>, vector<2x256xf32>
    %cst_17 = arith.constant dense<0.000000e+00> : vector<256xf32>
    %37 = vector.multi_reduction <add>, %36, %cst_17 [0] : vector<2x256xf32> to vector<256xf32>
    %38 = vector.shape_cast %37 : vector<256xf32> to vector<1x256xf32>
    %39 = vector.extract_strided_slice %11 {offsets = [2, 0], sizes = [2, 256], strides = [1, 1]} : vector<4x256xf32> to vector<2x256xf32>
    %40 = arith.subf %39, %25 : vector<2x256xf32>
    %41 = math.absf %40 : vector<2x256xf32>
    %cst_18 = arith.constant 1.000000e+00 : f32
    %42 = vector.broadcast %cst_18 : f32 to vector<2x256xf32>
    %43 = arith.cmpf olt, %41, %42 : vector<2x256xf32>
    %cst_19 = arith.constant 5.000000e-01 : f32
    %44 = vector.broadcast %cst_19 : f32 to vector<2x256xf32>
    %45 = arith.mulf %44, %41 : vector<2x256xf32>
    %46 = arith.mulf %45, %41 : vector<2x256xf32>
    %cst_20 = arith.constant 5.000000e-01 : f32
    %47 = vector.broadcast %cst_20 : f32 to vector<2x256xf32>
    %48 = arith.subf %41, %47 : vector<2x256xf32>
    %49 = arith.select %43, %46, %48 : vector<2x256xi1>, vector<2x256xf32>
    %cst_21 = arith.constant dense<0.000000e+00> : vector<256xf32>
    %50 = vector.multi_reduction <add>, %49, %cst_21 [0] : vector<2x256xf32> to vector<256xf32>
    %51 = vector.shape_cast %50 : vector<256xf32> to vector<1x256xf32>
    %52 = arith.addf %38, %51 : vector<1x256xf32>
    %cst_22 = arith.constant dense<0xFF800000> : vector<256xf32>
    %53 = vector.multi_reduction <maximumf>, %13, %cst_22 [0] : vector<8x256xf32> to vector<256xf32>
    %54 = vector.shape_cast %53 : vector<256xf32> to vector<1x256xf32>
    %55 = vector.broadcast %54 : vector<1x256xf32> to vector<8x256xf32>
    %56 = arith.subf %13, %55 : vector<8x256xf32>
    %57 = math.exp %56 : vector<8x256xf32>
    %cst_23 = arith.constant dense<0.000000e+00> : vector<256xf32>
    %58 = vector.multi_reduction <add>, %57, %cst_23 [0] : vector<8x256xf32> to vector<256xf32>
    %59 = vector.shape_cast %58 : vector<256xf32> to vector<1x256xf32>
    %60 = math.log %59 : vector<1x256xf32>
    %61 = arith.addf %60, %54 : vector<1x256xf32>
    %62 = vector.broadcast %7 : vector<1x256xi32> to vector<8x256xi32>
    %63 = arith.cmpi eq, %5, %62 : vector<8x256xi32>
    %cst_24 = arith.constant 0.000000e+00 : f32
    %64 = vector.broadcast %cst_24 : f32 to vector<8x256xf32>
    %65 = arith.select %63, %13, %64 : vector<8x256xi1>, vector<8x256xf32>
    %cst_25 = arith.constant dense<0.000000e+00> : vector<256xf32>
    %66 = vector.multi_reduction <add>, %65, %cst_25 [0] : vector<8x256xf32> to vector<256xf32>
    %67 = vector.shape_cast %66 : vector<256xf32> to vector<1x256xf32>
    %68 = arith.subf %61, %67 : vector<1x256xf32>
    %c0_26 = arith.constant 0 : index
    %c0_27 = arith.constant 0 : index
    %69 = vector.load %arg7[%c0_26, %c0_27] : memref<2x256xf32, #tpu.memory_space<vmem>>, vector<1x256xf32>
    tpu.vector_store %arg7[%c0_26, %c0_27], %17 {strides = array<i32>} : memref<2x256xf32, #tpu.memory_space<vmem>>, vector<1x256xf32>,
    %c0_28 = arith.constant 0 : index
    %c0_29 = arith.constant 0 : index
    %70 = vector.load %arg8[%c0_28, %c0_29] : memref<2x256xf32, #tpu.memory_space<vmem>>, vector<1x256xf32>
    tpu.vector_store %arg8[%c0_28, %c0_29], %68 {strides = array<i32>} : memref<2x256xf32, #tpu.memory_space<vmem>>, vector<1x256xf32>,
    %71 = arith.mulf %17, %52 : vector<1x256xf32>
    %c0_30 = arith.constant 0 : index
    %c0_31 = arith.constant 0 : index
    %72 = vector.load %arg9[%c0_30, %c0_31] : memref<2x256xf32, #tpu.memory_space<vmem>>, vector<1x256xf32>
    tpu.vector_store %arg9[%c0_30, %c0_31], %71 {strides = array<i32>} : memref<2x256xf32, #tpu.memory_space<vmem>>, vector<1x256xf32>,
    %c1 = arith.constant 1 : index
    %c0_32 = arith.constant 0 : index
    %c0_33 = arith.constant 0 : index
    %73 = vector.load %arg1[%c1, %c0_32, %c0_33] : memref<2x1x256xi32, #tpu.memory_space<vmem>>, vector<1x1x256xi32>
    %74 = vector.shape_cast %73 : vector<1x1x256xi32> to vector<1x256xi32>
    %c1_34 = arith.constant 1 : index
    %c0_35 = arith.constant 0 : index
    %c0_36 = arith.constant 0 : index
    %75 = vector.load %arg2[%c1_34, %c0_35, %c0_36] : memref<2x4x256xf32, #tpu.memory_space<vmem>>, vector<1x4x256xf32>
    %76 = vector.shape_cast %75 : vector<1x4x256xf32> to vector<4x256xf32>
    %c1_37 = arith.constant 1 : index
    %c0_38 = arith.constant 0 : index
    %c0_39 = arith.constant 0 : index
    %77 = vector.load %arg3[%c1_37, %c0_38, %c0_39] : memref<2x4x256xf32, #tpu.memory_space<vmem>>, vector<1x4x256xf32>
    %78 = vector.shape_cast %77 : vector<1x4x256xf32> to vector<4x256xf32>
    %c1_40 = arith.constant 1 : index
    %c0_41 = arith.constant 0 : index
    %c0_42 = arith.constant 0 : index
    %79 = vector.load %arg4[%c1_40, %c0_41, %c0_42] : memref<2x8x256xf32, #tpu.memory_space<vmem>>, vector<1x8x256xf32>
    %80 = vector.shape_cast %79 : vector<1x8x256xf32> to vector<8x256xf32>
    %c0_i32_43 = arith.constant 0 : i32
    %81 = vector.broadcast %c0_i32_43 : i32 to vector<1x256xi32>
    %82 = arith.cmpi sgt, %74, %81 : vector<1x256xi32>
    %83 = arith.extui %82 : vector<1x256xi1> to vector<1x256xi32>
    %84 = arith.sitofp %83 : vector<1x256xi32> to vector<1x256xf32>
    %85 = vector.extract_strided_slice %76 {offsets = [0, 0], sizes = [2, 256], strides = [1, 1]} : vector<4x256xf32> to vector<2x256xf32>
    %86 = arith.mulf %85, %2 : vector<2x256xf32>
    %87 = arith.subf %86, %3 : vector<2x256xf32>
    %88 = vector.extract_strided_slice %76 {offsets = [2, 0], sizes = [2, 256], strides = [1, 1]} : vector<4x256xf32> to vector<2x256xf32>
    %89 = math.log %88 : vector<2x256xf32>
    %cst_44 = arith.constant 5.000000e+00 : f32
    %90 = vector.broadcast %cst_44 : f32 to vector<2x256xf32>
    %91 = arith.mulf %90, %89 : vector<2x256xf32>
    %92 = arith.subf %91, %4 : vector<2x256xf32>
    %93 = vector.extract_strided_slice %78 {offsets = [0, 0], sizes = [2, 256], strides = [1, 1]} : vector<4x256xf32> to vector<2x256xf32>
    %94 = arith.subf %93, %87 : vector<2x256xf32>
    %95 = math.absf %94 : vector<2x256xf32>
    %cst_45 = arith.constant 1.000000e+00 : f32
    %96 = vector.broadcast %cst_45 : f32 to vector<2x256xf32>
    %97 = arith.cmpf olt, %95, %96 : vector<2x256xf32>
    %cst_46 = arith.constant 5.000000e-01 : f32
    %98 = vector.broadcast %cst_46 : f32 to vector<2x256xf32>
    %99 = arith.mulf %98, %95 : vector<2x256xf32>
    %100 = arith.mulf %99, %95 : vector<2x256xf32>
    %cst_47 = arith.constant 5.000000e-01 : f32
    %101 = vector.broadcast %cst_47 : f32 to vector<2x256xf32>
    %102 = arith.subf %95, %101 : vector<2x256xf32>
    %103 = arith.select %97, %100, %102 : vector<2x256xi1>, vector<2x256xf32>
    %cst_48 = arith.constant dense<0.000000e+00> : vector<256xf32>
    %104 = vector.multi_reduction <add>, %103, %cst_48 [0] : vector<2x256xf32> to vector<256xf32>
    %105 = vector.shape_cast %104 : vector<256xf32> to vector<1x256xf32>
    %106 = vector.extract_strided_slice %78 {offsets = [2, 0], sizes = [2, 256], strides = [1, 1]} : vector<4x256xf32> to vector<2x256xf32>
    %107 = arith.subf %106, %92 : vector<2x256xf32>
    %108 = math.absf %107 : vector<2x256xf32>
    %cst_49 = arith.constant 1.000000e+00 : f32
    %109 = vector.broadcast %cst_49 : f32 to vector<2x256xf32>
    %110 = arith.cmpf olt, %108, %109 : vector<2x256xf32>
    %cst_50 = arith.constant 5.000000e-01 : f32
    %111 = vector.broadcast %cst_50 : f32 to vector<2x256xf32>
    %112 = arith.mulf %111, %108 : vector<2x256xf32>
    %113 = arith.mulf %112, %108 : vector<2x256xf32>
    %cst_51 = arith.constant 5.000000e-01 : f32
    %114 = vector.broadcast %cst_51 : f32 to vector<2x256xf32>
    %115 = arith.subf %108, %114 : vector<2x256xf32>
    %116 = arith.select %110, %113, %115 : vector<2x256xi1>, vector<2x256xf32>
    %cst_52 = arith.constant dense<0.000000e+00> : vector<256xf32>
    %117 = vector.multi_reduction <add>, %116, %cst_52 [0] : vector<2x256xf32> to vector<256xf32>
    %118 = vector.shape_cast %117 : vector<256xf32> to vector<1x256xf32>
    %119 = arith.addf %105, %118 : vector<1x256xf32>
    %cst_53 = arith.constant dense<0xFF800000> : vector<256xf32>
    %120 = vector.multi_reduction <maximumf>, %80, %cst_53 [0] : vector<8x256xf32> to vector<256xf32>
    %121 = vector.shape_cast %120 : vector<256xf32> to vector<1x256xf32>
    %122 = vector.broadcast %121 : vector<1x256xf32> to vector<8x256xf32>
    %123 = arith.subf %80, %122 : vector<8x256xf32>
    %124 = math.exp %123 : vector<8x256xf32>
    %cst_54 = arith.constant dense<0.000000e+00> : vector<256xf32>
    %125 = vector.multi_reduction <add>, %124, %cst_54 [0] : vector<8x256xf32> to vector<256xf32>
    %126 = vector.shape_cast %125 : vector<256xf32> to vector<1x256xf32>
    %127 = math.log %126 : vector<1x256xf32>
    %128 = arith.addf %127, %121 : vector<1x256xf32>
    %129 = vector.broadcast %74 : vector<1x256xi32> to vector<8x256xi32>
    %130 = arith.cmpi eq, %5, %129 : vector<8x256xi32>
    %cst_55 = arith.constant 0.000000e+00 : f32
    %131 = vector.broadcast %cst_55 : f32 to vector<8x256xf32>
    %132 = arith.select %130, %80, %131 : vector<8x256xi1>, vector<8x256xf32>
    %cst_56 = arith.constant dense<0.000000e+00> : vector<256xf32>
    %133 = vector.multi_reduction <add>, %132, %cst_56 [0] : vector<8x256xf32> to vector<256xf32>
    %134 = vector.shape_cast %133 : vector<256xf32> to vector<1x256xf32>
    %135 = arith.subf %128, %134 : vector<1x256xf32>
    %c1_57 = arith.constant 1 : index
    %c0_58 = arith.constant 0 : index
    %136 = vector.load %arg7[%c1_57, %c0_58] : memref<2x256xf32, #tpu.memory_space<vmem>>, vector<1x256xf32>
    tpu.vector_store %arg7[%c1_57, %c0_58], %84 {strides = array<i32>} : memref<2x256xf32, #tpu.memory_space<vmem>>, vector<1x256xf32>,
    %c1_59 = arith.constant 1 : index
    %c0_60 = arith.constant 0 : index
    %137 = vector.load %arg8[%c1_59, %c0_60] : memref<2x256xf32, #tpu.memory_space<vmem>>, vector<1x256xf32>
    tpu.vector_store %arg8[%c1_59, %c0_60], %135 {strides = array<i32>} : memref<2x256xf32, #tpu.memory_space<vmem>>, vector<1x256xf32>,
    %138 = arith.mulf %84, %119 : vector<1x256xf32>
    %c1_61 = arith.constant 1 : index
    %c0_62 = arith.constant 0 : index
    %139 = vector.load %arg9[%c1_61, %c0_62] : memref<2x256xf32, #tpu.memory_space<vmem>>, vector<1x256xf32>
    tpu.vector_store %arg9[%c1_61, %c0_62], %138 {strides = array<i32>} : memref<2x256xf32, #tpu.memory_space<vmem>>, vector<1x256xf32>,
    %c0_63 = arith.constant 0 : index
    %c0_64 = arith.constant 0 : index
    %140 = vector.load %arg7[%c0_63, %c0_64] : memref<2x256xf32, #tpu.memory_space<vmem>>, vector<2x256xf32>
    %c0_65 = arith.constant 0 : index
    %c0_66 = arith.constant 0 : index
    %141 = vector.load %arg8[%c0_65, %c0_66] : memref<2x256xf32, #tpu.memory_space<vmem>>, vector<2x256xf32>
    %c0_67 = arith.constant 0 : index
    %c0_68 = arith.constant 0 : index
    %142 = vector.load %arg9[%c0_67, %c0_68] : memref<2x256xf32, #tpu.memory_space<vmem>>, vector<2x256xf32>
    %cst_69 = arith.constant 0.000000e+00 : f32
    %143 = vector.broadcast %cst_69 : f32 to vector<2x256xf32>
    %144 = arith.cmpf ogt, %140, %143 : vector<2x256xf32>
    %cst_70 = arith.constant 0.000000e+00 : f32
    %145 = vector.broadcast %cst_70 : f32 to vector<2x256xf32>
    %146 = arith.select %144, %145, %141 : vector<2x256xi1>, vector<2x256xf32>
    %147 = tpu.bitcast %146 : vector<2x256xf32> -> vector<2x256xi32>
    %cst_71 = arith.constant dense<0.000000e+00> : vector<2xf32>
    %148 = vector.multi_reduction <add>, %140, %cst_71 [1] : vector<2x256xf32> to vector<2xf32>
    %149 = vector.shape_cast %148 : vector<2xf32> to vector<2x1xf32>
    %cst_72 = arith.constant 3.000000e+00 : f32
    %150 = vector.broadcast %cst_72 : f32 to vector<2x1xf32>
    %151 = arith.mulf %150, %149 : vector<2x1xf32>
    %cst_73 = arith.constant 2.560000e+02 : f32
    %152 = vector.broadcast %cst_73 : f32 to vector<2x1xf32>
    %153 = arith.minimumf %151, %152 : vector<2x1xf32>
    %c0_i32_74 = arith.constant 0 : i32
    %154 = vector.broadcast %c0_i32_74 : i32 to vector<2x1xi32>
    %c1073741824_i32 = arith.constant 1073741824 : i32
    %155 = vector.broadcast %c1073741824_i32 : i32 to vector<2x1xi32>
    %156 = arith.ori %154, %155 : vector<2x1xi32>
    %157 = vector.broadcast %156 : vector<2x1xi32> to vector<2x256xi32>
    %158 = arith.cmpi sge, %147, %157 : vector<2x256xi32>
    %159 = arith.extui %158 : vector<2x256xi1> to vector<2x256xi32>
    %160 = arith.sitofp %159 : vector<2x256xi32> to vector<2x256xf32>
    %cst_75 = arith.constant dense<0.000000e+00> : vector<2xf32>
    %161 = vector.multi_reduction <add>, %160, %cst_75 [1] : vector<2x256xf32> to vector<2xf32>
    %162 = vector.shape_cast %161 : vector<2xf32> to vector<2x1xf32>
    %163 = arith.cmpf oge, %162, %153 : vector<2x1xf32>
    %164 = arith.select %163, %156, %154 : vector<2x1xi1>, vector<2x1xi32>
    %c536870912_i32 = arith.constant 536870912 : i32
    %165 = vector.broadcast %c536870912_i32 : i32 to vector<2x1xi32>
    %166 = arith.ori %164, %165 : vector<2x1xi32>
    %167 = vector.broadcast %166 : vector<2x1xi32> to vector<2x256xi32>
    %168 = arith.cmpi sge, %147, %167 : vector<2x256xi32>
    %169 = arith.extui %168 : vector<2x256xi1> to vector<2x256xi32>
    %170 = arith.sitofp %169 : vector<2x256xi32> to vector<2x256xf32>
    %cst_76 = arith.constant dense<0.000000e+00> : vector<2xf32>
    %171 = vector.multi_reduction <add>, %170, %cst_76 [1] : vector<2x256xf32> to vector<2xf32>
    %172 = vector.shape_cast %171 : vector<2xf32> to vector<2x1xf32>
    %173 = arith.cmpf oge, %172, %153 : vector<2x1xf32>
    %174 = arith.select %173, %166, %164 : vector<2x1xi1>, vector<2x1xi32>
    %c268435456_i32 = arith.constant 268435456 : i32
    %175 = vector.broadcast %c268435456_i32 : i32 to vector<2x1xi32>
    %176 = arith.ori %174, %175 : vector<2x1xi32>
    %177 = vector.broadcast %176 : vector<2x1xi32> to vector<2x256xi32>
    %178 = arith.cmpi sge, %147, %177 : vector<2x256xi32>
    %179 = arith.extui %178 : vector<2x256xi1> to vector<2x256xi32>
    %180 = arith.sitofp %179 : vector<2x256xi32> to vector<2x256xf32>
    %cst_77 = arith.constant dense<0.000000e+00> : vector<2xf32>
    %181 = vector.multi_reduction <add>, %180, %cst_77 [1] : vector<2x256xf32> to vector<2xf32>
    %182 = vector.shape_cast %181 : vector<2xf32> to vector<2x1xf32>
    %183 = arith.cmpf oge, %182, %153 : vector<2x1xf32>
    %184 = arith.select %183, %176, %174 : vector<2x1xi1>, vector<2x1xi32>
    %c134217728_i32 = arith.constant 134217728 : i32
    %185 = vector.broadcast %c134217728_i32 : i32 to vector<2x1xi32>
    %186 = arith.ori %184, %185 : vector<2x1xi32>
    %187 = vector.broadcast %186 : vector<2x1xi32> to vector<2x256xi32>
    %188 = arith.cmpi sge, %147, %187 : vector<2x256xi32>
    %189 = arith.extui %188 : vector<2x256xi1> to vector<2x256xi32>
    %190 = arith.sitofp %189 : vector<2x256xi32> to vector<2x256xf32>
    %cst_78 = arith.constant dense<0.000000e+00> : vector<2xf32>
    %191 = vector.multi_reduction <add>, %190, %cst_78 [1] : vector<2x256xf32> to vector<2xf32>
    %192 = vector.shape_cast %191 : vector<2xf32> to vector<2x1xf32>
    %193 = arith.cmpf oge, %192, %153 : vector<2x1xf32>
    %194 = arith.select %193, %186, %184 : vector<2x1xi1>, vector<2x1xi32>
    %c67108864_i32 = arith.constant 67108864 : i32
    %195 = vector.broadcast %c67108864_i32 : i32 to vector<2x1xi32>
    %196 = arith.ori %194, %195 : vector<2x1xi32>
    %197 = vector.broadcast %196 : vector<2x1xi32> to vector<2x256xi32>
    %198 = arith.cmpi sge, %147, %197 : vector<2x256xi32>
    %199 = arith.extui %198 : vector<2x256xi1> to vector<2x256xi32>
    %200 = arith.sitofp %199 : vector<2x256xi32> to vector<2x256xf32>
    %cst_79 = arith.constant dense<0.000000e+00> : vector<2xf32>
    %201 = vector.multi_reduction <add>, %200, %cst_79 [1] : vector<2x256xf32> to vector<2xf32>
    %202 = vector.shape_cast %201 : vector<2xf32> to vector<2x1xf32>
    %203 = arith.cmpf oge, %202, %153 : vector<2x1xf32>
    %204 = arith.select %203, %196, %194 : vector<2x1xi1>, vector<2x1xi32>
    %c33554432_i32 = arith.constant 33554432 : i32
    %205 = vector.broadcast %c33554432_i32 : i32 to vector<2x1xi32>
    %206 = arith.ori %204, %205 : vector<2x1xi32>
    %207 = vector.broadcast %206 : vector<2x1xi32> to vector<2x256xi32>
    %208 = arith.cmpi sge, %147, %207 : vector<2x256xi32>
    %209 = arith.extui %208 : vector<2x256xi1> to vector<2x256xi32>
    %210 = arith.sitofp %209 : vector<2x256xi32> to vector<2x256xf32>
    %cst_80 = arith.constant dense<0.000000e+00> : vector<2xf32>
    %211 = vector.multi_reduction <add>, %210, %cst_80 [1] : vector<2x256xf32> to vector<2xf32>
    %212 = vector.shape_cast %211 : vector<2xf32> to vector<2x1xf32>
    %213 = arith.cmpf oge, %212, %153 : vector<2x1xf32>
    %214 = arith.select %213, %206, %204 : vector<2x1xi1>, vector<2x1xi32>
    %c16777216_i32 = arith.constant 16777216 : i32
    %215 = vector.broadcast %c16777216_i32 : i32 to vector<2x1xi32>
    %216 = arith.ori %214, %215 : vector<2x1xi32>
    %217 = vector.broadcast %216 : vector<2x1xi32> to vector<2x256xi32>
    %218 = arith.cmpi sge, %147, %217 : vector<2x256xi32>
    %219 = arith.extui %218 : vector<2x256xi1> to vector<2x256xi32>
    %220 = arith.sitofp %219 : vector<2x256xi32> to vector<2x256xf32>
    %cst_81 = arith.constant dense<0.000000e+00> : vector<2xf32>
    %221 = vector.multi_reduction <add>, %220, %cst_81 [1] : vector<2x256xf32> to vector<2xf32>
    %222 = vector.shape_cast %221 : vector<2xf32> to vector<2x1xf32>
    %223 = arith.cmpf oge, %222, %153 : vector<2x1xf32>
    %224 = arith.select %223, %216, %214 : vector<2x1xi1>, vector<2x1xi32>
    %c8388608_i32 = arith.constant 8388608 : i32
    %225 = vector.broadcast %c8388608_i32 : i32 to vector<2x1xi32>
    %226 = arith.ori %224, %225 : vector<2x1xi32>
    %227 = vector.broadcast %226 : vector<2x1xi32> to vector<2x256xi32>
    %228 = arith.cmpi sge, %147, %227 : vector<2x256xi32>
    %229 = arith.extui %228 : vector<2x256xi1> to vector<2x256xi32>
    %230 = arith.sitofp %229 : vector<2x256xi32> to vector<2x256xf32>
    %cst_82 = arith.constant dense<0.000000e+00> : vector<2xf32>
    %231 = vector.multi_reduction <add>, %230, %cst_82 [1] : vector<2x256xf32> to vector<2xf32>
    %232 = vector.shape_cast %231 : vector<2xf32> to vector<2x1xf32>
    %233 = arith.cmpf oge, %232, %153 : vector<2x1xf32>
    %234 = arith.select %233, %226, %224 : vector<2x1xi1>, vector<2x1xi32>
    %c4194304_i32 = arith.constant 4194304 : i32
    %235 = vector.broadcast %c4194304_i32 : i32 to vector<2x1xi32>
    %236 = arith.ori %234, %235 : vector<2x1xi32>
    %237 = vector.broadcast %236 : vector<2x1xi32> to vector<2x256xi32>
    %238 = arith.cmpi sge, %147, %237 : vector<2x256xi32>
    %239 = arith.extui %238 : vector<2x256xi1> to vector<2x256xi32>
    %240 = arith.sitofp %239 : vector<2x256xi32> to vector<2x256xf32>
    %cst_83 = arith.constant dense<0.000000e+00> : vector<2xf32>
    %241 = vector.multi_reduction <add>, %240, %cst_83 [1] : vector<2x256xf32> to vector<2xf32>
    %242 = vector.shape_cast %241 : vector<2xf32> to vector<2x1xf32>
    %243 = arith.cmpf oge, %242, %153 : vector<2x1xf32>
    %244 = arith.select %243, %236, %234 : vector<2x1xi1>, vector<2x1xi32>
    %c2097152_i32 = arith.constant 2097152 : i32
    %245 = vector.broadcast %c2097152_i32 : i32 to vector<2x1xi32>
    %246 = arith.ori %244, %245 : vector<2x1xi32>
    %247 = vector.broadcast %246 : vector<2x1xi32> to vector<2x256xi32>
    %248 = arith.cmpi sge, %147, %247 : vector<2x256xi32>
    %249 = arith.extui %248 : vector<2x256xi1> to vector<2x256xi32>
    %250 = arith.sitofp %249 : vector<2x256xi32> to vector<2x256xf32>
    %cst_84 = arith.constant dense<0.000000e+00> : vector<2xf32>
    %251 = vector.multi_reduction <add>, %250, %cst_84 [1] : vector<2x256xf32> to vector<2xf32>
    %252 = vector.shape_cast %251 : vector<2xf32> to vector<2x1xf32>
    %253 = arith.cmpf oge, %252, %153 : vector<2x1xf32>
    %254 = arith.select %253, %246, %244 : vector<2x1xi1>, vector<2x1xi32>
    %c1048576_i32 = arith.constant 1048576 : i32
    %255 = vector.broadcast %c1048576_i32 : i32 to vector<2x1xi32>
    %256 = arith.ori %254, %255 : vector<2x1xi32>
    %257 = vector.broadcast %256 : vector<2x1xi32> to vector<2x256xi32>
    %258 = arith.cmpi sge, %147, %257 : vector<2x256xi32>
    %259 = arith.extui %258 : vector<2x256xi1> to vector<2x256xi32>
    %260 = arith.sitofp %259 : vector<2x256xi32> to vector<2x256xf32>
    %cst_85 = arith.constant dense<0.000000e+00> : vector<2xf32>
    %261 = vector.multi_reduction <add>, %260, %cst_85 [1] : vector<2x256xf32> to vector<2xf32>
    %262 = vector.shape_cast %261 : vector<2xf32> to vector<2x1xf32>
    %263 = arith.cmpf oge, %262, %153 : vector<2x1xf32>
    %264 = arith.select %263, %256, %254 : vector<2x1xi1>, vector<2x1xi32>
    %c524288_i32 = arith.constant 524288 : i32
    %265 = vector.broadcast %c524288_i32 : i32 to vector<2x1xi32>
    %266 = arith.ori %264, %265 : vector<2x1xi32>
    %267 = vector.broadcast %266 : vector<2x1xi32> to vector<2x256xi32>
    %268 = arith.cmpi sge, %147, %267 : vector<2x256xi32>
    %269 = arith.extui %268 : vector<2x256xi1> to vector<2x256xi32>
    %270 = arith.sitofp %269 : vector<2x256xi32> to vector<2x256xf32>
    %cst_86 = arith.constant dense<0.000000e+00> : vector<2xf32>
    %271 = vector.multi_reduction <add>, %270, %cst_86 [1] : vector<2x256xf32> to vector<2xf32>
    %272 = vector.shape_cast %271 : vector<2xf32> to vector<2x1xf32>
    %273 = arith.cmpf oge, %272, %153 : vector<2x1xf32>
    %274 = arith.select %273, %266, %264 : vector<2x1xi1>, vector<2x1xi32>
    %c262144_i32 = arith.constant 262144 : i32
    %275 = vector.broadcast %c262144_i32 : i32 to vector<2x1xi32>
    %276 = arith.ori %274, %275 : vector<2x1xi32>
    %277 = vector.broadcast %276 : vector<2x1xi32> to vector<2x256xi32>
    %278 = arith.cmpi sge, %147, %277 : vector<2x256xi32>
    %279 = arith.extui %278 : vector<2x256xi1> to vector<2x256xi32>
    %280 = arith.sitofp %279 : vector<2x256xi32> to vector<2x256xf32>
    %cst_87 = arith.constant dense<0.000000e+00> : vector<2xf32>
    %281 = vector.multi_reduction <add>, %280, %cst_87 [1] : vector<2x256xf32> to vector<2xf32>
    %282 = vector.shape_cast %281 : vector<2xf32> to vector<2x1xf32>
    %283 = arith.cmpf oge, %282, %153 : vector<2x1xf32>
    %284 = arith.select %283, %276, %274 : vector<2x1xi1>, vector<2x1xi32>
    %c131072_i32 = arith.constant 131072 : i32
    %285 = vector.broadcast %c131072_i32 : i32 to vector<2x1xi32>
    %286 = arith.ori %284, %285 : vector<2x1xi32>
    %287 = vector.broadcast %286 : vector<2x1xi32> to vector<2x256xi32>
    %288 = arith.cmpi sge, %147, %287 : vector<2x256xi32>
    %289 = arith.extui %288 : vector<2x256xi1> to vector<2x256xi32>
    %290 = arith.sitofp %289 : vector<2x256xi32> to vector<2x256xf32>
    %cst_88 = arith.constant dense<0.000000e+00> : vector<2xf32>
    %291 = vector.multi_reduction <add>, %290, %cst_88 [1] : vector<2x256xf32> to vector<2xf32>
    %292 = vector.shape_cast %291 : vector<2xf32> to vector<2x1xf32>
    %293 = arith.cmpf oge, %292, %153 : vector<2x1xf32>
    %294 = arith.select %293, %286, %284 : vector<2x1xi1>, vector<2x1xi32>
    %c65536_i32 = arith.constant 65536 : i32
    %295 = vector.broadcast %c65536_i32 : i32 to vector<2x1xi32>
    %296 = arith.ori %294, %295 : vector<2x1xi32>
    %297 = vector.broadcast %296 : vector<2x1xi32> to vector<2x256xi32>
    %298 = arith.cmpi sge, %147, %297 : vector<2x256xi32>
    %299 = arith.extui %298 : vector<2x256xi1> to vector<2x256xi32>
    %300 = arith.sitofp %299 : vector<2x256xi32> to vector<2x256xf32>
    %cst_89 = arith.constant dense<0.000000e+00> : vector<2xf32>
    %301 = vector.multi_reduction <add>, %300, %cst_89 [1] : vector<2x256xf32> to vector<2xf32>
    %302 = vector.shape_cast %301 : vector<2xf32> to vector<2x1xf32>
    %303 = arith.cmpf oge, %302, %153 : vector<2x1xf32>
    %304 = arith.select %303, %296, %294 : vector<2x1xi1>, vector<2x1xi32>
    %c32768_i32 = arith.constant 32768 : i32
    %305 = vector.broadcast %c32768_i32 : i32 to vector<2x1xi32>
    %306 = arith.ori %304, %305 : vector<2x1xi32>
    %307 = vector.broadcast %306 : vector<2x1xi32> to vector<2x256xi32>
    %308 = arith.cmpi sge, %147, %307 : vector<2x256xi32>
    %309 = arith.extui %308 : vector<2x256xi1> to vector<2x256xi32>
    %310 = arith.sitofp %309 : vector<2x256xi32> to vector<2x256xf32>
    %cst_90 = arith.constant dense<0.000000e+00> : vector<2xf32>
    %311 = vector.multi_reduction <add>, %310, %cst_90 [1] : vector<2x256xf32> to vector<2xf32>
    %312 = vector.shape_cast %311 : vector<2xf32> to vector<2x1xf32>
    %313 = arith.cmpf oge, %312, %153 : vector<2x1xf32>
    %314 = arith.select %313, %306, %304 : vector<2x1xi1>, vector<2x1xi32>
    %c16384_i32 = arith.constant 16384 : i32
    %315 = vector.broadcast %c16384_i32 : i32 to vector<2x1xi32>
    %316 = arith.ori %314, %315 : vector<2x1xi32>
    %317 = vector.broadcast %316 : vector<2x1xi32> to vector<2x256xi32>
    %318 = arith.cmpi sge, %147, %317 : vector<2x256xi32>
    %319 = arith.extui %318 : vector<2x256xi1> to vector<2x256xi32>
    %320 = arith.sitofp %319 : vector<2x256xi32> to vector<2x256xf32>
    %cst_91 = arith.constant dense<0.000000e+00> : vector<2xf32>
    %321 = vector.multi_reduction <add>, %320, %cst_91 [1] : vector<2x256xf32> to vector<2xf32>
    %322 = vector.shape_cast %321 : vector<2xf32> to vector<2x1xf32>
    %323 = arith.cmpf oge, %322, %153 : vector<2x1xf32>
    %324 = arith.select %323, %316, %314 : vector<2x1xi1>, vector<2x1xi32>
    %c8192_i32 = arith.constant 8192 : i32
    %325 = vector.broadcast %c8192_i32 : i32 to vector<2x1xi32>
    %326 = arith.ori %324, %325 : vector<2x1xi32>
    %327 = vector.broadcast %326 : vector<2x1xi32> to vector<2x256xi32>
    %328 = arith.cmpi sge, %147, %327 : vector<2x256xi32>
    %329 = arith.extui %328 : vector<2x256xi1> to vector<2x256xi32>
    %330 = arith.sitofp %329 : vector<2x256xi32> to vector<2x256xf32>
    %cst_92 = arith.constant dense<0.000000e+00> : vector<2xf32>
    %331 = vector.multi_reduction <add>, %330, %cst_92 [1] : vector<2x256xf32> to vector<2xf32>
    %332 = vector.shape_cast %331 : vector<2xf32> to vector<2x1xf32>
    %333 = arith.cmpf oge, %332, %153 : vector<2x1xf32>
    %334 = arith.select %333, %326, %324 : vector<2x1xi1>, vector<2x1xi32>
    %c4096_i32 = arith.constant 4096 : i32
    %335 = vector.broadcast %c4096_i32 : i32 to vector<2x1xi32>
    %336 = arith.ori %334, %335 : vector<2x1xi32>
    %337 = vector.broadcast %336 : vector<2x1xi32> to vector<2x256xi32>
    %338 = arith.cmpi sge, %147, %337 : vector<2x256xi32>
    %339 = arith.extui %338 : vector<2x256xi1> to vector<2x256xi32>
    %340 = arith.sitofp %339 : vector<2x256xi32> to vector<2x256xf32>
    %cst_93 = arith.constant dense<0.000000e+00> : vector<2xf32>
    %341 = vector.multi_reduction <add>, %340, %cst_93 [1] : vector<2x256xf32> to vector<2xf32>
    %342 = vector.shape_cast %341 : vector<2xf32> to vector<2x1xf32>
    %343 = arith.cmpf oge, %342, %153 : vector<2x1xf32>
    %344 = arith.select %343, %336, %334 : vector<2x1xi1>, vector<2x1xi32>
    %c2048_i32 = arith.constant 2048 : i32
    %345 = vector.broadcast %c2048_i32 : i32 to vector<2x1xi32>
    %346 = arith.ori %344, %345 : vector<2x1xi32>
    %347 = vector.broadcast %346 : vector<2x1xi32> to vector<2x256xi32>
    %348 = arith.cmpi sge, %147, %347 : vector<2x256xi32>
    %349 = arith.extui %348 : vector<2x256xi1> to vector<2x256xi32>
    %350 = arith.sitofp %349 : vector<2x256xi32> to vector<2x256xf32>
    %cst_94 = arith.constant dense<0.000000e+00> : vector<2xf32>
    %351 = vector.multi_reduction <add>, %350, %cst_94 [1] : vector<2x256xf32> to vector<2xf32>
    %352 = vector.shape_cast %351 : vector<2xf32> to vector<2x1xf32>
    %353 = arith.cmpf oge, %352, %153 : vector<2x1xf32>
    %354 = arith.select %353, %346, %344 : vector<2x1xi1>, vector<2x1xi32>
    %c1024_i32 = arith.constant 1024 : i32
    %355 = vector.broadcast %c1024_i32 : i32 to vector<2x1xi32>
    %356 = arith.ori %354, %355 : vector<2x1xi32>
    %357 = vector.broadcast %356 : vector<2x1xi32> to vector<2x256xi32>
    %358 = arith.cmpi sge, %147, %357 : vector<2x256xi32>
    %359 = arith.extui %358 : vector<2x256xi1> to vector<2x256xi32>
    %360 = arith.sitofp %359 : vector<2x256xi32> to vector<2x256xf32>
    %cst_95 = arith.constant dense<0.000000e+00> : vector<2xf32>
    %361 = vector.multi_reduction <add>, %360, %cst_95 [1] : vector<2x256xf32> to vector<2xf32>
    %362 = vector.shape_cast %361 : vector<2xf32> to vector<2x1xf32>
    %363 = arith.cmpf oge, %362, %153 : vector<2x1xf32>
    %364 = arith.select %363, %356, %354 : vector<2x1xi1>, vector<2x1xi32>
    %c512_i32 = arith.constant 512 : i32
    %365 = vector.broadcast %c512_i32 : i32 to vector<2x1xi32>
    %366 = arith.ori %364, %365 : vector<2x1xi32>
    %367 = vector.broadcast %366 : vector<2x1xi32> to vector<2x256xi32>
    %368 = arith.cmpi sge, %147, %367 : vector<2x256xi32>
    %369 = arith.extui %368 : vector<2x256xi1> to vector<2x256xi32>
    %370 = arith.sitofp %369 : vector<2x256xi32> to vector<2x256xf32>
    %cst_96 = arith.constant dense<0.000000e+00> : vector<2xf32>
    %371 = vector.multi_reduction <add>, %370, %cst_96 [1] : vector<2x256xf32> to vector<2xf32>
    %372 = vector.shape_cast %371 : vector<2xf32> to vector<2x1xf32>
    %373 = arith.cmpf oge, %372, %153 : vector<2x1xf32>
    %374 = arith.select %373, %366, %364 : vector<2x1xi1>, vector<2x1xi32>
    %c256_i32 = arith.constant 256 : i32
    %375 = vector.broadcast %c256_i32 : i32 to vector<2x1xi32>
    %376 = arith.ori %374, %375 : vector<2x1xi32>
    %377 = vector.broadcast %376 : vector<2x1xi32> to vector<2x256xi32>
    %378 = arith.cmpi sge, %147, %377 : vector<2x256xi32>
    %379 = arith.extui %378 : vector<2x256xi1> to vector<2x256xi32>
    %380 = arith.sitofp %379 : vector<2x256xi32> to vector<2x256xf32>
    %cst_97 = arith.constant dense<0.000000e+00> : vector<2xf32>
    %381 = vector.multi_reduction <add>, %380, %cst_97 [1] : vector<2x256xf32> to vector<2xf32>
    %382 = vector.shape_cast %381 : vector<2xf32> to vector<2x1xf32>
    %383 = arith.cmpf oge, %382, %153 : vector<2x1xf32>
    %384 = arith.select %383, %376, %374 : vector<2x1xi1>, vector<2x1xi32>
    %c128_i32 = arith.constant 128 : i32
    %385 = vector.broadcast %c128_i32 : i32 to vector<2x1xi32>
    %386 = arith.ori %384, %385 : vector<2x1xi32>
    %387 = vector.broadcast %386 : vector<2x1xi32> to vector<2x256xi32>
    %388 = arith.cmpi sge, %147, %387 : vector<2x256xi32>
    %389 = arith.extui %388 : vector<2x256xi1> to vector<2x256xi32>
    %390 = arith.sitofp %389 : vector<2x256xi32> to vector<2x256xf32>
    %cst_98 = arith.constant dense<0.000000e+00> : vector<2xf32>
    %391 = vector.multi_reduction <add>, %390, %cst_98 [1] : vector<2x256xf32> to vector<2xf32>
    %392 = vector.shape_cast %391 : vector<2xf32> to vector<2x1xf32>
    %393 = arith.cmpf oge, %392, %153 : vector<2x1xf32>
    %394 = arith.select %393, %386, %384 : vector<2x1xi1>, vector<2x1xi32>
    %c64_i32 = arith.constant 64 : i32
    %395 = vector.broadcast %c64_i32 : i32 to vector<2x1xi32>
    %396 = arith.ori %394, %395 : vector<2x1xi32>
    %397 = vector.broadcast %396 : vector<2x1xi32> to vector<2x256xi32>
    %398 = arith.cmpi sge, %147, %397 : vector<2x256xi32>
    %399 = arith.extui %398 : vector<2x256xi1> to vector<2x256xi32>
    %400 = arith.sitofp %399 : vector<2x256xi32> to vector<2x256xf32>
    %cst_99 = arith.constant dense<0.000000e+00> : vector<2xf32>
    %401 = vector.multi_reduction <add>, %400, %cst_99 [1] : vector<2x256xf32> to vector<2xf32>
    %402 = vector.shape_cast %401 : vector<2xf32> to vector<2x1xf32>
    %403 = arith.cmpf oge, %402, %153 : vector<2x1xf32>
    %404 = arith.select %403, %396, %394 : vector<2x1xi1>, vector<2x1xi32>
    %c32_i32 = arith.constant 32 : i32
    %405 = vector.broadcast %c32_i32 : i32 to vector<2x1xi32>
    %406 = arith.ori %404, %405 : vector<2x1xi32>
    %407 = vector.broadcast %406 : vector<2x1xi32> to vector<2x256xi32>
    %408 = arith.cmpi sge, %147, %407 : vector<2x256xi32>
    %409 = arith.extui %408 : vector<2x256xi1> to vector<2x256xi32>
    %410 = arith.sitofp %409 : vector<2x256xi32> to vector<2x256xf32>
    %cst_100 = arith.constant dense<0.000000e+00> : vector<2xf32>
    %411 = vector.multi_reduction <add>, %410, %cst_100 [1] : vector<2x256xf32> to vector<2xf32>
    %412 = vector.shape_cast %411 : vector<2xf32> to vector<2x1xf32>
    %413 = arith.cmpf oge, %412, %153 : vector<2x1xf32>
    %414 = arith.select %413, %406, %404 : vector<2x1xi1>, vector<2x1xi32>
    %c16_i32 = arith.constant 16 : i32
    %415 = vector.broadcast %c16_i32 : i32 to vector<2x1xi32>
    %416 = arith.ori %414, %415 : vector<2x1xi32>
    %417 = vector.broadcast %416 : vector<2x1xi32> to vector<2x256xi32>
    %418 = arith.cmpi sge, %147, %417 : vector<2x256xi32>
    %419 = arith.extui %418 : vector<2x256xi1> to vector<2x256xi32>
    %420 = arith.sitofp %419 : vector<2x256xi32> to vector<2x256xf32>
    %cst_101 = arith.constant dense<0.000000e+00> : vector<2xf32>
    %421 = vector.multi_reduction <add>, %420, %cst_101 [1] : vector<2x256xf32> to vector<2xf32>
    %422 = vector.shape_cast %421 : vector<2xf32> to vector<2x1xf32>
    %423 = arith.cmpf oge, %422, %153 : vector<2x1xf32>
    %424 = arith.select %423, %416, %414 : vector<2x1xi1>, vector<2x1xi32>
    %c8_i32 = arith.constant 8 : i32
    %425 = vector.broadcast %c8_i32 : i32 to vector<2x1xi32>
    %426 = arith.ori %424, %425 : vector<2x1xi32>
    %427 = vector.broadcast %426 : vector<2x1xi32> to vector<2x256xi32>
    %428 = arith.cmpi sge, %147, %427 : vector<2x256xi32>
    %429 = arith.extui %428 : vector<2x256xi1> to vector<2x256xi32>
    %430 = arith.sitofp %429 : vector<2x256xi32> to vector<2x256xf32>
    %cst_102 = arith.constant dense<0.000000e+00> : vector<2xf32>
    %431 = vector.multi_reduction <add>, %430, %cst_102 [1] : vector<2x256xf32> to vector<2xf32>
    %432 = vector.shape_cast %431 : vector<2xf32> to vector<2x1xf32>
    %433 = arith.cmpf oge, %432, %153 : vector<2x1xf32>
    %434 = arith.select %433, %426, %424 : vector<2x1xi1>, vector<2x1xi32>
    %c4_i32 = arith.constant 4 : i32
    %435 = vector.broadcast %c4_i32 : i32 to vector<2x1xi32>
    %436 = arith.ori %434, %435 : vector<2x1xi32>
    %437 = vector.broadcast %436 : vector<2x1xi32> to vector<2x256xi32>
    %438 = arith.cmpi sge, %147, %437 : vector<2x256xi32>
    %439 = arith.extui %438 : vector<2x256xi1> to vector<2x256xi32>
    %440 = arith.sitofp %439 : vector<2x256xi32> to vector<2x256xf32>
    %cst_103 = arith.constant dense<0.000000e+00> : vector<2xf32>
    %441 = vector.multi_reduction <add>, %440, %cst_103 [1] : vector<2x256xf32> to vector<2xf32>
    %442 = vector.shape_cast %441 : vector<2xf32> to vector<2x1xf32>
    %443 = arith.cmpf oge, %442, %153 : vector<2x1xf32>
    %444 = arith.select %443, %436, %434 : vector<2x1xi1>, vector<2x1xi32>
    %c2_i32 = arith.constant 2 : i32
    %445 = vector.broadcast %c2_i32 : i32 to vector<2x1xi32>
    %446 = arith.ori %444, %445 : vector<2x1xi32>
    %447 = vector.broadcast %446 : vector<2x1xi32> to vector<2x256xi32>
    %448 = arith.cmpi sge, %147, %447 : vector<2x256xi32>
    %449 = arith.extui %448 : vector<2x256xi1> to vector<2x256xi32>
    %450 = arith.sitofp %449 : vector<2x256xi32> to vector<2x256xf32>
    %cst_104 = arith.constant dense<0.000000e+00> : vector<2xf32>
    %451 = vector.multi_reduction <add>, %450, %cst_104 [1] : vector<2x256xf32> to vector<2xf32>
    %452 = vector.shape_cast %451 : vector<2xf32> to vector<2x1xf32>
    %453 = arith.cmpf oge, %452, %153 : vector<2x1xf32>
    %454 = arith.select %453, %446, %444 : vector<2x1xi1>, vector<2x1xi32>
    %c1_i32 = arith.constant 1 : i32
    %455 = vector.broadcast %c1_i32 : i32 to vector<2x1xi32>
    %456 = arith.ori %454, %455 : vector<2x1xi32>
    %457 = vector.broadcast %456 : vector<2x1xi32> to vector<2x256xi32>
    %458 = arith.cmpi sge, %147, %457 : vector<2x256xi32>
    %459 = arith.extui %458 : vector<2x256xi1> to vector<2x256xi32>
    %460 = arith.sitofp %459 : vector<2x256xi32> to vector<2x256xf32>
    %cst_105 = arith.constant dense<0.000000e+00> : vector<2xf32>
    %461 = vector.multi_reduction <add>, %460, %cst_105 [1] : vector<2x256xf32> to vector<2xf32>
    %462 = vector.shape_cast %461 : vector<2xf32> to vector<2x1xf32>
    %463 = arith.cmpf oge, %462, %153 : vector<2x1xf32>
    %464 = arith.select %463, %456, %454 : vector<2x1xi1>, vector<2x1xi32>
    %465 = vector.broadcast %464 : vector<2x1xi32> to vector<2x256xi32>
    %466 = arith.cmpi sgt, %147, %465 : vector<2x256xi32>
    %467 = arith.extui %466 : vector<2x256xi1> to vector<2x256xi32>
    %468 = arith.sitofp %467 : vector<2x256xi32> to vector<2x256xf32>
    %cst_106 = arith.constant dense<0.000000e+00> : vector<2xf32>
    %469 = vector.multi_reduction <add>, %468, %cst_106 [1] : vector<2x256xf32> to vector<2xf32>
    %470 = vector.shape_cast %469 : vector<2xf32> to vector<2x1xf32>
    %471 = arith.subf %153, %470 : vector<2x1xf32>
    %472 = vector.broadcast %464 : vector<2x1xi32> to vector<2x256xi32>
    %473 = arith.cmpi eq, %147, %472 : vector<2x256xi32>
    %474 = tpu.iota {dimensions = array<i32: 1>} : vector<2x256xi32>
    %c0_i32_107 = arith.constant 0 : i32
    %475 = vector.broadcast %c0_i32_107 : i32 to vector<2x1xi32>
    %c128_i32_108 = arith.constant 128 : i32
    %476 = vector.broadcast %c128_i32_108 : i32 to vector<2x1xi32>
    %477 = arith.ori %475, %476 : vector<2x1xi32>
    %478 = vector.broadcast %477 : vector<2x1xi32> to vector<2x256xi32>
    %479 = arith.cmpi slt, %474, %478 : vector<2x256xi32>
    %480 = arith.andi %473, %479 : vector<2x256xi1>
    %481 = arith.extui %480 : vector<2x256xi1> to vector<2x256xi32>
    %482 = arith.sitofp %481 : vector<2x256xi32> to vector<2x256xf32>
    %cst_109 = arith.constant dense<0.000000e+00> : vector<2xf32>
    %483 = vector.multi_reduction <add>, %482, %cst_109 [1] : vector<2x256xf32> to vector<2xf32>
    %484 = vector.shape_cast %483 : vector<2xf32> to vector<2x1xf32>
    %485 = arith.cmpf olt, %484, %471 : vector<2x1xf32>
    %486 = arith.select %485, %477, %475 : vector<2x1xi1>, vector<2x1xi32>
    %c64_i32_110 = arith.constant 64 : i32
    %487 = vector.broadcast %c64_i32_110 : i32 to vector<2x1xi32>
    %488 = arith.ori %486, %487 : vector<2x1xi32>
    %489 = vector.broadcast %488 : vector<2x1xi32> to vector<2x256xi32>
    %490 = arith.cmpi slt, %474, %489 : vector<2x256xi32>
    %491 = arith.andi %473, %490 : vector<2x256xi1>
    %492 = arith.extui %491 : vector<2x256xi1> to vector<2x256xi32>
    %493 = arith.sitofp %492 : vector<2x256xi32> to vector<2x256xf32>
    %cst_111 = arith.constant dense<0.000000e+00> : vector<2xf32>
    %494 = vector.multi_reduction <add>, %493, %cst_111 [1] : vector<2x256xf32> to vector<2xf32>
    %495 = vector.shape_cast %494 : vector<2xf32> to vector<2x1xf32>
    %496 = arith.cmpf olt, %495, %471 : vector<2x1xf32>
    %497 = arith.select %496, %488, %486 : vector<2x1xi1>, vector<2x1xi32>
    %c32_i32_112 = arith.constant 32 : i32
    %498 = vector.broadcast %c32_i32_112 : i32 to vector<2x1xi32>
    %499 = arith.ori %497, %498 : vector<2x1xi32>
    %500 = vector.broadcast %499 : vector<2x1xi32> to vector<2x256xi32>
    %501 = arith.cmpi slt, %474, %500 : vector<2x256xi32>
    %502 = arith.andi %473, %501 : vector<2x256xi1>
    %503 = arith.extui %502 : vector<2x256xi1> to vector<2x256xi32>
    %504 = arith.sitofp %503 : vector<2x256xi32> to vector<2x256xf32>
    %cst_113 = arith.constant dense<0.000000e+00> : vector<2xf32>
    %505 = vector.multi_reduction <add>, %504, %cst_113 [1] : vector<2x256xf32> to vector<2xf32>
    %506 = vector.shape_cast %505 : vector<2xf32> to vector<2x1xf32>
    %507 = arith.cmpf olt, %506, %471 : vector<2x1xf32>
    %508 = arith.select %507, %499, %497 : vector<2x1xi1>, vector<2x1xi32>
    %c16_i32_114 = arith.constant 16 : i32
    %509 = vector.broadcast %c16_i32_114 : i32 to vector<2x1xi32>
    %510 = arith.ori %508, %509 : vector<2x1xi32>
    %511 = vector.broadcast %510 : vector<2x1xi32> to vector<2x256xi32>
    %512 = arith.cmpi slt, %474, %511 : vector<2x256xi32>
    %513 = arith.andi %473, %512 : vector<2x256xi1>
    %514 = arith.extui %513 : vector<2x256xi1> to vector<2x256xi32>
    %515 = arith.sitofp %514 : vector<2x256xi32> to vector<2x256xf32>
    %cst_115 = arith.constant dense<0.000000e+00> : vector<2xf32>
    %516 = vector.multi_reduction <add>, %515, %cst_115 [1] : vector<2x256xf32> to vector<2xf32>
    %517 = vector.shape_cast %516 : vector<2xf32> to vector<2x1xf32>
    %518 = arith.cmpf olt, %517, %471 : vector<2x1xf32>
    %519 = arith.select %518, %510, %508 : vector<2x1xi1>, vector<2x1xi32>
    %c8_i32_116 = arith.constant 8 : i32
    %520 = vector.broadcast %c8_i32_116 : i32 to vector<2x1xi32>
    %521 = arith.ori %519, %520 : vector<2x1xi32>
    %522 = vector.broadcast %521 : vector<2x1xi32> to vector<2x256xi32>
    %523 = arith.cmpi slt, %474, %522 : vector<2x256xi32>
    %524 = arith.andi %473, %523 : vector<2x256xi1>
    %525 = arith.extui %524 : vector<2x256xi1> to vector<2x256xi32>
    %526 = arith.sitofp %525 : vector<2x256xi32> to vector<2x256xf32>
    %cst_117 = arith.constant dense<0.000000e+00> : vector<2xf32>
    %527 = vector.multi_reduction <add>, %526, %cst_117 [1] : vector<2x256xf32> to vector<2xf32>
    %528 = vector.shape_cast %527 : vector<2xf32> to vector<2x1xf32>
    %529 = arith.cmpf olt, %528, %471 : vector<2x1xf32>
    %530 = arith.select %529, %521, %519 : vector<2x1xi1>, vector<2x1xi32>
    %c4_i32_118 = arith.constant 4 : i32
    %531 = vector.broadcast %c4_i32_118 : i32 to vector<2x1xi32>
    %532 = arith.ori %530, %531 : vector<2x1xi32>
    %533 = vector.broadcast %532 : vector<2x1xi32> to vector<2x256xi32>
    %534 = arith.cmpi slt, %474, %533 : vector<2x256xi32>
    %535 = arith.andi %473, %534 : vector<2x256xi1>
    %536 = arith.extui %535 : vector<2x256xi1> to vector<2x256xi32>
    %537 = arith.sitofp %536 : vector<2x256xi32> to vector<2x256xf32>
    %cst_119 = arith.constant dense<0.000000e+00> : vector<2xf32>
    %538 = vector.multi_reduction <add>, %537, %cst_119 [1] : vector<2x256xf32> to vector<2xf32>
    %539 = vector.shape_cast %538 : vector<2xf32> to vector<2x1xf32>
    %540 = arith.cmpf olt, %539, %471 : vector<2x1xf32>
    %541 = arith.select %540, %532, %530 : vector<2x1xi1>, vector<2x1xi32>
    %c2_i32_120 = arith.constant 2 : i32
    %542 = vector.broadcast %c2_i32_120 : i32 to vector<2x1xi32>
    %543 = arith.ori %541, %542 : vector<2x1xi32>
    %544 = vector.broadcast %543 : vector<2x1xi32> to vector<2x256xi32>
    %545 = arith.cmpi slt, %474, %544 : vector<2x256xi32>
    %546 = arith.andi %473, %545 : vector<2x256xi1>
    %547 = arith.extui %546 : vector<2x256xi1> to vector<2x256xi32>
    %548 = arith.sitofp %547 : vector<2x256xi32> to vector<2x256xf32>
    %cst_121 = arith.constant dense<0.000000e+00> : vector<2xf32>
    %549 = vector.multi_reduction <add>, %548, %cst_121 [1] : vector<2x256xf32> to vector<2xf32>
    %550 = vector.shape_cast %549 : vector<2xf32> to vector<2x1xf32>
    %551 = arith.cmpf olt, %550, %471 : vector<2x1xf32>
    %552 = arith.select %551, %543, %541 : vector<2x1xi1>, vector<2x1xi32>
    %c1_i32_122 = arith.constant 1 : i32
    %553 = vector.broadcast %c1_i32_122 : i32 to vector<2x1xi32>
    %554 = arith.ori %552, %553 : vector<2x1xi32>
    %555 = vector.broadcast %554 : vector<2x1xi32> to vector<2x256xi32>
    %556 = arith.cmpi slt, %474, %555 : vector<2x256xi32>
    %557 = arith.andi %473, %556 : vector<2x256xi1>
    %558 = arith.extui %557 : vector<2x256xi1> to vector<2x256xi32>
    %559 = arith.sitofp %558 : vector<2x256xi32> to vector<2x256xf32>
    %cst_123 = arith.constant dense<0.000000e+00> : vector<2xf32>
    %560 = vector.multi_reduction <add>, %559, %cst_123 [1] : vector<2x256xf32> to vector<2xf32>
    %561 = vector.shape_cast %560 : vector<2xf32> to vector<2x1xf32>
    %562 = arith.cmpf olt, %561, %471 : vector<2x1xf32>
    %563 = arith.select %562, %554, %552 : vector<2x1xi1>, vector<2x1xi32>
    %c1_i32_124 = arith.constant 1 : i32
    %564 = vector.broadcast %c1_i32_124 : i32 to vector<2x1xi32>
    %565 = arith.addi %563, %564 : vector<2x1xi32>
    %566 = vector.broadcast %464 : vector<2x1xi32> to vector<2x256xi32>
    %567 = arith.cmpi sgt, %147, %566 : vector<2x256xi32>
    %568 = vector.broadcast %565 : vector<2x1xi32> to vector<2x256xi32>
    %569 = arith.cmpi slt, %474, %568 : vector<2x256xi32>
    %570 = arith.andi %473, %569 : vector<2x256xi1>
    %571 = arith.ori %567, %570 : vector<2x256xi1>
    %572 = arith.extui %571 : vector<2x256xi1> to vector<2x256xi32>
    %573 = arith.sitofp %572 : vector<2x256xi32> to vector<2x256xf32>
    %574 = arith.addf %140, %573 : vector<2x256xf32>
    %575 = arith.mulf %141, %574 : vector<2x256xf32>
    %cst_125 = arith.constant dense<0.000000e+00> : vector<2xf32>
    %576 = vector.multi_reduction <add>, %575, %cst_125 [1] : vector<2x256xf32> to vector<2xf32>
    %577 = vector.shape_cast %576 : vector<2xf32> to vector<2x1xf32>
    %cst_126 = arith.constant dense<0.000000e+00> : vector<2xf32>
    %578 = vector.multi_reduction <add>, %142, %cst_126 [1] : vector<2x256xf32> to vector<2xf32>
    %579 = vector.shape_cast %578 : vector<2xf32> to vector<2x1xf32>
    %580 = arith.addf %579, %577 : vector<2x1xf32>
    %cst_127 = arith.constant 0.000000e+00 : f32
    %581 = vector.broadcast %cst_127 : f32 to vector<2x1xf32>
    %582 = arith.cmpf ogt, %149, %581 : vector<2x1xf32>
    %583 = arith.extui %582 : vector<2x1xi1> to vector<2x1xi32>
    %584 = arith.sitofp %583 : vector<2x1xi32> to vector<2x1xf32>
    %cst_128 = arith.constant 9.99999997E-7 : f32
    %585 = vector.broadcast %cst_128 : f32 to vector<2x1xf32>
    %586 = arith.maximumf %149, %585 : vector<2x1xf32>
    %587 = arith.mulf %580, %584 : vector<2x1xf32>
    %588 = arith.divf %587, %586 : vector<2x1xf32>
    %c0_129 = arith.constant 0 : index
    %c0_130 = arith.constant 0 : index
    %c0_131 = arith.constant 0 : index
    %589 = vector.load %arg6[%c0_129, %c0_130, %c0_131] : memref<1x2x1xf32, #tpu.memory_space<vmem>>, vector<1x2x1xf32>
    %590 = vector.shape_cast %589 : vector<1x2x1xf32> to vector<2x1xf32>
    %591 = vector.shape_cast %588 : vector<2x1xf32> to vector<1x2x1xf32>
    tpu.vector_store %arg6[%c0_129, %c0_130, %c0_131], %591 {strides = array<i32>} : memref<1x2x1xf32, #tpu.memory_space<vmem>>, vector<1x2x1xf32>,
    return
  }
  func.func @transform_0(%arg0: i32) -> (i32, i32, i32) {
    %c0_i32 = arith.constant 0 : i32
    %c0_i32_0 = arith.constant 0 : i32
    %c0_i32_1 = arith.constant 0 : i32
    return %arg0, %c0_i32, %c0_i32_0 : i32, i32, i32
  }
  func.func @transform_1(%arg0: i32) -> (i32, i32, i32) {
    %c0_i32 = arith.constant 0 : i32
    %c0_i32_0 = arith.constant 0 : i32
    %c0_i32_1 = arith.constant 0 : i32
    return %arg0, %c0_i32, %c0_i32_0 : i32, i32, i32
  }
  func.func @transform_2(%arg0: i32) -> (i32, i32, i32) {
    %c0_i32 = arith.constant 0 : i32
    %c0_i32_0 = arith.constant 0 : i32
    %c0_i32_1 = arith.constant 0 : i32
    return %arg0, %c0_i32, %c0_i32_0 : i32, i32, i32
  }
  func.func @transform_3(%arg0: i32) -> (i32, i32, i32) {
    %c0_i32 = arith.constant 0 : i32
    %c0_i32_0 = arith.constant 0 : i32
    %c0_i32_1 = arith.constant 0 : i32
    return %arg0, %c0_i32, %c0_i32_0 : i32, i32, i32
  }
  func.func @transform_4(%arg0: i32) -> (i32, i32, i32) {
    %c0_i32 = arith.constant 0 : i32
    %c0_i32_0 = arith.constant 0 : i32
    %c0_i32_1 = arith.constant 0 : i32
    %c0_i32_2 = arith.constant 0 : i32
    return %c0_i32, %c0_i32_0, %c0_i32_1 : i32, i32, i32
  }
  func.func @transform_5(%arg0: i32) -> (i32, i32, i32) {
    %c0_i32 = arith.constant 0 : i32
    %c0_i32_0 = arith.constant 0 : i32
    %c0_i32_1 = arith.constant 0 : i32
    return %arg0, %c0_i32, %c0_i32_0 : i32, i32, i32
  }
}

</mosaic_0001>

<bundles_post_ra>
// kernel: tpu_custom_call.1
= control target key start
LH: loop header
LB: loop body
LE: loop exit
PB: predicated region body
PF: predicated region fallthrough
CT: control target
= control target key end

     0   :  { %10 = vsyncpa [#allocation6], 0  ;;  %s1849_s0 = inlined_call_operand.vmem [shape: s32[2,1,256], index: 0, kind: input, shape index: {}]   ;;  %s1850_s1 = inlined_call_operand.hbm [shape: f32[2,4,256], index: 1, kind: input, shape index: {}]   ;;  %s1851_s2 = inlined_call_operand.hbm [shape: f32[2,4,256], index: 2, kind: input, shape index: {}]   ;;  %s1852_s3 = inlined_call_operand.vmem [shape: f32[2,8,256], index: 3, kind: input, shape index: {}]   ;;  %s1853_s4 = inlined_call_operand.vmem [shape: f32[1,6,256], index: 4, kind: input, shape index: {}]   ;;  %s1854_s5 = inlined_call_operand.vmem [shape: f32[1,2,1], index: 5, kind: output, shape index: {}]  }
   0x1   :  { %11 = vsyncpa [#allocation8], 0  ;;  %s1268_s18 = smov [#allocation5]   ;;  %s1220_s22 = scalar_lea.hbm %s1850_s1, 256 }
   0x2   :  { %s19_s19 = sshll.u32 %s1268_s18, 4  ;;  %p1221_p0 = scmp.ne.s32.totalorder %s1850_s1, %s1220_s22  ;;  %s20_s19 = int_to_ptr.vmem [resolvable:$true] %s19_s19 }
   0x3   :  { %p1224_p1 = scmp.lt.u32.totalorder %s1220_s22, %s1850_s1 }
   0x5   :  { %p1226_p2 = pnand %p1224_p1, %p1221_p0 }
   0x7   :  { %1229 = shalt.err (!%p1226_p2)
}
   0x8   :  { %s1230_s27 = scalar_lea.vmem %s20_s19, 256  ;;  %p1235_p4 = scmp.lt.s32.totalorder %s20_s19, %s20_s19 }
   0x9   :  { %p1231_p3 = scmp.ne.s32.totalorder %s20_s19, %s1230_s27  ;;  %p1236_p5 = scmp.lt.s32.totalorder %s1230_s27, %s1230_s27 }
   0xb   :  { %p1237_p6 = por %p1236_p5, %p1235_p4 }
   0xd   :  { %p1238_p7 = pnand %p1237_p6, %p1231_p3 }
   0xf   :  { %1241 = shalt.err (!%p1238_p7)
}
  0x10   :  { %s1269_s28 = smov 128   ;;  %s1270_s29 = smov 8  }
  0x11   :  { %25 = dma.hbm_to_vmem [thread:$0]  %s1850_s1, 256, %s20_s19, [#allocation6], %s1269_s28, %s1269_s28, %s1270_s29  }
  0x12   :  { %s1271_s7 = smov [#allocation7]   ;;  %s1242_s11 = scalar_lea.hbm %s1851_s2, 256 }
  0x13   :  { %s31_s8 = sshll.u32 %s1271_s7, 4  ;;  %p1243_p8 = scmp.ne.s32.totalorder %s1851_s2, %s1242_s11  ;;  %s32_s8 = int_to_ptr.vmem [resolvable:$true] %s31_s8 }
  0x14   :  { %p1246_p9 = scmp.lt.u32.totalorder %s1242_s11, %s1851_s2 }
  0x16   :  { %p1248_p10 = pnand %p1246_p9, %p1243_p8 }
  0x18   :  { %1251 = shalt.err (!%p1248_p10)
}
  0x19   :  { %s1252_s16 = scalar_lea.vmem %s32_s8, 256  ;;  %p1257_p12 = scmp.lt.s32.totalorder %s32_s8, %s32_s8 }
  0x1a   :  { %p1253_p11 = scmp.ne.s32.totalorder %s32_s8, %s1252_s16  ;;  %p1258_p13 = scmp.lt.s32.totalorder %s1252_s16, %s1252_s16 }
  0x1c   :  { %p1259_p0 = por %p1258_p13, %p1257_p12 }
  0x1e   :  { %p1260_p1 = pnand %p1259_p0, %p1253_p11 }
  0x20   :  { %1263 = shalt.err (!%p1260_p1)
}
  0x21   :  { %37 = dma.hbm_to_vmem [thread:$0]  %s1851_s2, 256, %s32_s8, [#allocation8], %s1269_s28, %s1269_s28, %s1270_s29  }
  0x22   :  { %1264 = dma.done.wait [#allocation6], 256  }
  0x23   :  { %1265 = vsyncadd [#allocation6], 4294967040 }
  0x24   :  { %1266 = dma.done.wait [#allocation8], 256  }
  0x25   :  { %1267 = vsyncadd [#allocation8], 4294967040  ;;  %v50_v0 = vlaneseq  ;;  %v1333_v1 = vld [vmem:[%s1849_s0] sm:$0x3]  ;;  %v1343_v3 = vld [vmem:[%s1852_s3 + $0x8] sm:$0xff]  ;;  %v1272_v9 = vmov 0.0  }
  0x26   :  { %v1338_v2 = vld [vmem:[%s1852_s3] sm:$0xff]  ;;  %vm57_vm1 = vcmp.gt.s32.totalorder %v1333_v1, 0  ;;  %v136_v6 = vrot.slane %v1343_v3, 4  ;;  %v1359_v8 = vld [vmem:[%s1852_s3 + $0x10] sm:$0xff]  ;;  %v1367_v11 = vld [vmem:[%s1852_s3 + $0x18] sm:$0xff]  ;;  %vm86_vm3 = vcmask 1041408  }
  0x27   :  { %vm1346_vm0 = vcmp.lt.s32.totalorder %v50_v0, 256  ;;  %v130_v5 = vrot.slane %v1338_v2, 4  ;;  %v1096_v7 = vld [vmem:[%s1849_s0 + $0x2] sm:$0x3]  ;;  %v1362_v10 = vsel %vm57_vm1, 1.0, %v1272_v9  ;;  %v307_v12 = vrot.slane %v1359_v8, 4 }
  0x28   :  { %vm245_vm2 = vcmp.gt.s32.totalorder %v1096_v7, 0  ;;  %v137_v14 = vmax.f32 %v1343_v3, %v136_v6  ;;  %196 = vst.msk [vmem:[#allocation2] ss:$2 sm:$0x3] %vm1346_vm0, %v1362_v10  ;;  %v313_v17 = vrot.slane %v1367_v11, 4  ;;  %v1385_v33 = vshrl.u32 %v50_v0, 7 }
  0x29   :  { %v131_v13 = vmax.f32 %v1338_v2, %v130_v5  ;;  %v1376_v15 = vsel %vm245_vm2, 1.0, %v1272_v9  ;;  %v308_v16 = vmax.f32 %v1359_v8, %v307_v12  ;;  %v1273_v20 = vmov 1983009808  }
  0x2a   :  { %370 = vst.msk [vmem:[#allocation2 + $0x1] ss:$2 sm:$0x3] %vm1346_vm0, %v1376_v15  ;;  %v138_v19 = vrot.slane %v137_v14, 2  ;;  %v419_v21 = vunpack.c.l.s4 %v1273_v20  ;;  %v314_v23 = vmax.f32 %v1367_v11, %v313_v17  ;;  %v168_v48 = vsub.s32 0, %v1385_v33 }
  0x2b   :  { %v132_v18 = vrot.slane %v131_v13, 2  ;;  %v309_v22 = vrot.slane %v308_v16, 2  ;;  %v172_v50 = vsub.s32 1, %v1385_v33 }
  0x2c   :  { %v139_v25 = vmax.f32 %v137_v14, %v138_v19  ;;  %v315_v27 = vrot.slane %v314_v23, 2  ;;  %v420_v30 = vunpack.c.0.s8 %v419_v21  ;;  %v169_v54 = vrot.slane %v1333_v1, %v168_v48 }
  0x2d   :  { %v133_v24 = vmax.f32 %v131_v13, %v132_v18  ;;  %v310_v26 = vmax.f32 %v308_v16, %v309_v22  ;;  %v173_v56 = vrot.slane %v1333_v1, %v172_v50  ;;  %v346_v58 = vrot.slane %v1096_v7, %v168_v48 }
  0x2e   :  { %v140_v29 = vrot.slane %v139_v25, 1  ;;  %v316_v32 = vmax.f32 %v314_v23, %v315_v27  ;;  %v1398_v40 = vsub.s32 %v420_v30, %v1385_v33  ;;  %v350_v59 = vrot.slane %v1096_v7, %v172_v50 }
  0x2f   :  { %v134_v28 = vrot.slane %v133_v24, 1  ;;  %v311_v31 = vrot.slane %v310_v26, 1  ;;  %vm174_vm4 = vcmp.eq.s32.totalorder %v1385_v33, %v169_v54  ;;  %vm175_vm5 = vcmp.eq.s32.totalorder %v1385_v33, %v173_v56 }
  0x30   :  { %v1389_v35 = vmax.f32 %v139_v25, %v140_v29  ;;  %v317_v37 = vrot.slane %v316_v32, 1  ;;  %vm351_vm6 = vcmp.eq.s32.totalorder %v1385_v33, %v346_v58  ;;  %v176_v63 = vsel %vm174_vm4, %v1338_v2, 0.0 }
  0x31   :  { %v1387_v34 = vmax.f32 %v133_v24, %v134_v28  ;;  %v1391_v36 = vmax.f32 %v310_v26, %v311_v31  ;;  %v1404_v43 = vld [vmem:[#allocation2] sm:$0xf]  ;;  %vm352_vm7 = vcmp.eq.s32.totalorder %v1385_v33, %v350_v59  ;;  %v177_v1 = vsel %vm175_vm5, %v1343_v3, 0.0 }
  0x32   :  { %v143_v39 = vsub.f32 %v1343_v3, %v1389_v35  ;;  %v1400_v41 = vmax.f32 %v316_v32, %v317_v37  ;;  %v433_v49 = vrot.slane %v1404_v43, %v1398_v40  ;;  %v353_v14 = vsel %vm351_vm6, %v1359_v8, 0.0 }
  0x33   :  { %v142_v38 = vsub.f32 %v1338_v2, %v1387_v34  ;;  %v319_v42 = vsub.f32 %v1359_v8, %v1391_v36  ;;  %v178_v17 = vrot.slane %v176_v63, 4  ;;  %v354_v19 = vsel %vm352_vm7, %v1367_v11, 0.0 }
  0x34   :  { %v146_v45 = vmul.f32 1.442695, %v143_v39  ;;  %v320_v46 = vsub.f32 %v1367_v11, %v1400_v41  ;;  %v434_v52 = vcombine.high %v433_v49, %v433_v49  ;;  %v437_v53 = vsel %vm86_vm3, %v433_v49, 0.0 }
  0x35   :  { %v144_v44 = vmul.f32 1.442695, %v142_v38  ;;  %v321_v47 = vmul.f32 1.442695, %v319_v42  ;;  %v184_v21 = vrot.slane %v177_v1, 4  ;;  %v355_v24 = vrot.slane %v353_v14, 4 }
  0x36   :  { %v323_v51 = vmul.f32 1.442695, %v320_v46  ;;  %v438_v55 = vsel %vm86_vm3, %v434_v52, 0.0  ;;  %v361_v27 = vrot.slane %v354_v19, 4  ;;  %v179_v28 = vadd.f32 %v178_v17, %v176_v63 }
  0x37   :  { %1196 = vpow2.f32 %v144_v44  ;;  %v439_v57 = vadd.f32 %v438_v55, %v437_v53  ;;  %v185_v31 = vadd.f32 %v184_v21, %v177_v1  ;;  %v356_v38 = vadd.f32 %v355_v24, %v353_v14 }
  0x38   :  { %1198 = vpow2.f32 %v146_v45  ;;  %v362_v42 = vadd.f32 %v361_v27, %v354_v19  ;;  %v180_v45 = vrot.slane %v179_v28, 2  ;;  %v1274_v58 = vmov 1966171168  }
  0x39   :  { %1200 = vpow2.f32 %v321_v47  ;;  %440 = vadd.xlane.f32.xlu0 %v439_v57  ;;  %v186_v47 = vrot.slane %v185_v31, 2  ;;  %v357_v50 = vrot.slane %v356_v38, 2  ;;  %v201_v59 = vunpack.c.l.s4 %v1274_v58 }
  0x3a   :  { %1202 = vpow2.f32 %v323_v51  ;;  %v363_v51 = vrot.slane %v362_v42, 2  ;;  %v181_v52 = vadd.f32 %v180_v45, %v179_v28  ;;  %vm415_vm8 = vcmp.gt.f32.partialorder %v1404_v43, 0.0 }
  0x3b   :  { %v187_v53 = vadd.f32 %v186_v47, %v185_v31  ;;  %v358_v54 = vadd.f32 %v357_v50, %v356_v38  ;;  %v1275_v45 = vmov 0  }
  0x3c   :  { %v364_v55 = vadd.f32 %v363_v51, %v362_v42  ;;  %v182_v56 = vrot.slane %v181_v52, 1 }
  0x3d   :  { %v188_v57 = vrot.slane %v187_v53, 1 }
  0x41   :  { %v1197_v60 = vpop.eup %1196 }
  0x42   :  { %v1199_v61 = vpop.eup %1198  ;;  %v148_v62 = vrot.slane %v1197_v60, 4 }
  0x43   :  { %v1201_v5 = vpop.eup %1200  ;;  %v154_v6 = vrot.slane %v1199_v61, 4 }
  0x44   :  { %v1203_v12 = vpop.eup %1202  ;;  %v149_v7 = vadd.f32 %v1197_v60, %v148_v62  ;;  %v325_v13 = vrot.slane %v1201_v5, 4  ;;  %v359_v60 = vrot.slane %v358_v54, 1  ;;  %v365_v62 = vrot.slane %v364_v55, 1 }
  0x45   :  { %v155_v16 = vadd.f32 %v1199_v61, %v154_v6  ;;  %v331_v18 = vrot.slane %v1203_v12, 4  ;;  %v183_v6 = vadd.f32 %v182_v56, %v181_v52 }
  0x46   :  { %v150_v20 = vrot.slane %v149_v7, 2  ;;  %v326_v22 = vadd.f32 %v1201_v5, %v325_v13  ;;  %v202_v13 = vunpack.c.0.s8 %v201_v59  ;;  %v366_v21 = vadd.f32 %v365_v62, %v364_v55 }
  0x47   :  { %v156_v2 = vrot.slane %v155_v16, 2  ;;  %v332_v23 = vadd.f32 %v1203_v12, %v331_v18  ;;  %v360_v18 = vadd.f32 %v359_v60, %v358_v54 }
  0x48   :  { %v151_v25 = vadd.f32 %v150_v20, %v149_v7  ;;  %v327_v26 = vrot.slane %v326_v22, 2  ;;  %v189_v7 = vadd.f32 %v188_v57, %v187_v53  ;;  %v1428_v24 = vsub.s32 %v202_v13, %v1385_v33 }
  0x49   :  { %v157_v3 = vadd.f32 %v156_v2, %v155_v16  ;;  %v333_v29 = vrot.slane %v332_v23, 2 }
  0x4a   :  { %v152_v30 = vrot.slane %v151_v25, 1  ;;  %v328_v8 = vadd.f32 %v327_v26, %v326_v22 }
  0x4b   :  { %v158_v32 = vrot.slane %v157_v3, 1  ;;  %v334_v37 = vadd.f32 %v333_v29, %v332_v23 }
  0x4c   :  { %v153_v39 = vadd.f32 %v152_v30, %v151_v25  ;;  %v329_v11 = vrot.slane %v328_v8, 1 }
  0x4d   :  { %v159_v44 = vadd.f32 %v158_v32, %v157_v3  ;;  %v335_v46 = vrot.slane %v334_v37, 1 }
  0x4e   :  { %1204 = vlog2.f32 %v153_v39  ;;  %v330_v48 = vadd.f32 %v329_v11, %v328_v8 }
  0x4f   :  { %1206 = vlog2.f32 %v159_v44  ;;  %v336_v49 = vadd.f32 %v335_v46, %v334_v37 }
  0x50   :  { %1208 = vlog2.f32 %v330_v48 }
  0x51   :  { %1210 = vlog2.f32 %v336_v49 }
  0x58   :  { %v1205_v61 = vpop.eup %1204 }
  0x59   :  { %v1207_v63 = vpop.eup %1206  ;;  %v161_v5 = vmul.f32 0.6931472, %v1205_v61 }
  0x5a   :  { %v1209_v1 = vpop.eup %1208  ;;  %v163_v12 = vmul.f32 0.6931472, %v1207_v63 }
  0x5b   :  { %v1211_v14 = vpop.eup %1210  ;;  %v164_v16 = vadd.f32 %v161_v5, %v1387_v34  ;;  %v338_v17 = vmul.f32 0.6931472, %v1209_v1 }
  0x5c   :  { %v165_v19 = vadd.f32 %v163_v12, %v1389_v35  ;;  %v340_v20 = vmul.f32 0.6931472, %v1211_v14 }
  0x5d   :  { %v190_v22 = vsub.f32 %v164_v16, %v183_v6  ;;  %v341_v2 = vadd.f32 %v338_v17, %v1391_v36 }
  0x5e   :  { %v191_v23 = vsub.f32 %v165_v19, %v189_v7  ;;  %v342_v25 = vadd.f32 %v340_v20, %v1400_v41 }
  0x5f   :  { %v367_v26 = vsub.f32 %v341_v2, %v360_v18 }
  0x60   :  { %v199_v27 = vcombine.low %v190_v22, %v191_v23  ;;  %v368_v3 = vsub.f32 %v342_v25, %v366_v21 }
  0x62   :  { %v206_v34 = vrot.slane %v199_v27, %v1428_v24  ;;  %v373_v28 = vcombine.low %v367_v26, %v368_v3 }
  0x64   :  { %v213_v29 = vrot.slane %v206_v34, %v1428_v24  ;;  %v380_v35 = vrot.slane %v373_v28, %v1428_v24 }
  0x66   :  { %215 = vst.msk [vmem:[#allocation3] ss:$2 sm:$0x3] %vm1346_vm0, %v213_v29  ;;  %v387_v36 = vrot.slane %v380_v35, %v1428_v24 }
  0x68   :  { %390 = vst.msk [vmem:[#allocation3 + $0x1] ss:$2 sm:$0x3] %vm1346_vm0, %v387_v36 }
  0x6f   :  { %v413_v33 = vld [vmem:[#allocation3] sm:$0xf] }
  0x70   :  { %v416_v41 = vsel %vm415_vm8, 0.0, %v413_v33 }
  0x71   :  { %v1441_v30 = vrot.slane %v416_v41, %v1398_v40 }
  0x73   :  { %v1445_v31 = vcombine.high %v1441_v30, %v1441_v30  ;;  %vm444_vm9 = vcmp.ge.s32.totalorder %v1441_v30, 1073741824 }
  0x74   :  { %v1102_v8 = vsel %vm444_vm9, 1.0, %v1272_v9 }
  0x75   :  { %vm445_vm10 = vcmp.ge.s32.totalorder %v1445_v31, 1073741824  ;;  %v450_v32 = vsel %vm86_vm3, %v1102_v8, 0.0 }
  0x76   :  { %v1103_v37 = vsel %vm445_vm10, 1.0, %v1272_v9 }
  0x77   :  { %v451_v43 = vsel %vm86_vm3, %v1103_v37, 0.0 }
  0x78   :  { %v452_v38 = vadd.f32 %v451_v43, %v450_v32 }
  0x7a   :  { %453 = vadd.xlane.f32.xlu0 %v452_v38 }
  0xc6   :  { %v1453_v39 = vpop.xlane.xlu0 %440 }
  0xc7   :  { %v442_v11 = vmul.f32 3.0, %v1453_v39 }
  0xc9   :  { %v1456_v42 = vmin.f32 %v442_v11, 256.0 }
 0x107   :  { %v454_v44 = vpop.xlane.xlu0 %453 }
 0x108   :  { %vm455_vm11 = vcmp.ge.f32.partialorder %v454_v44, %v1456_v42 }
 0x109   :  { %v456_v46 = vsel %vm455_vm11, 1073741824, %v1275_v45 }
 0x10a   :  { %v457_v47 = vor.u32 536870912, %v456_v46 }
 0x10c   :  { %vm458_vm12 = vcmp.ge.s32.totalorder %v1441_v30, %v457_v47  ;;  %vm459_vm13 = vcmp.ge.s32.totalorder %v1445_v31, %v457_v47 }
 0x10d   :  { %v1104_v48 = vsel %vm458_vm12, 1.0, %v1272_v9  ;;  %v1105_v49 = vsel %vm459_vm13, 1.0, %v1272_v9 }
 0x10e   :  { %v464_v50 = vsel %vm86_vm3, %v1104_v48, 0.0  ;;  %v465_v51 = vsel %vm86_vm3, %v1105_v49, 0.0 }
 0x10f   :  { %v466_v52 = vadd.f32 %v465_v51, %v464_v50 }
 0x111   :  { %467 = vadd.xlane.f32.xlu1 %v466_v52 }
 0x19e   :  { %v468_v53 = vpop.xlane.xlu1 %467 }
 0x19f   :  { %vm469_vm14 = vcmp.ge.f32.partialorder %v468_v53, %v1456_v42 }
 0x1a0   :  { %v470_v54 = vsel %vm469_vm14, %v457_v47, %v456_v46 }
 0x1a1   :  { %v471_v55 = vor.u32 268435456, %v470_v54 }
 0x1a3   :  { %vm472_vm15 = vcmp.ge.s32.totalorder %v1441_v30, %v471_v55  ;;  %vm473_vm1 = vcmp.ge.s32.totalorder %v1445_v31, %v471_v55 }
 0x1a4   :  { %v1106_v56 = vsel %vm472_vm15, 1.0, %v1272_v9  ;;  %v1107_v57 = vsel %vm473_vm1, 1.0, %v1272_v9 }
 0x1a5   :  { %v478_v58 = vsel %vm86_vm3, %v1106_v56, 0.0  ;;  %v479_v59 = vsel %vm86_vm3, %v1107_v57, 0.0 }
 0x1a6   :  { %v480_v60 = vadd.f32 %v479_v59, %v478_v58 }
 0x1a8   :  { %481 = vadd.xlane.f32.xlu1 %v480_v60 }
 0x235   :  { %v482_v61 = vpop.xlane.xlu1 %481 }
 0x236   :  { %vm483_vm2 = vcmp.ge.f32.partialorder %v482_v61, %v1456_v42 }
 0x237   :  { %v484_v62 = vsel %vm483_vm2, %v471_v55, %v470_v54 }
 0x238   :  { %v485_v63 = vor.u32 134217728, %v484_v62 }
 0x23a   :  { %vm486_vm4 = vcmp.ge.s32.totalorder %v1441_v30, %v485_v63  ;;  %vm487_vm5 = vcmp.ge.s32.totalorder %v1445_v31, %v485_v63 }
 0x23b   :  { %v1108_v5 = vsel %vm486_vm4, 1.0, %v1272_v9  ;;  %v1109_v6 = vsel %vm487_vm5, 1.0, %v1272_v9 }
 0x23c   :  { %v492_v1 = vsel %vm86_vm3, %v1108_v5, 0.0  ;;  %v493_v12 = vsel %vm86_vm3, %v1109_v6, 0.0 }
 0x23d   :  { %v494_v7 = vadd.f32 %v493_v12, %v492_v1 }
 0x23f   :  { %495 = vadd.xlane.f32.xlu0 %v494_v7 }
 0x2cc   :  { %v496_v13 = vpop.xlane.xlu0 %495 }
 0x2cd   :  { %vm497_vm6 = vcmp.ge.f32.partialorder %v496_v13, %v1456_v42 }
 0x2ce   :  { %v498_v14 = vsel %vm497_vm6, %v485_v63, %v484_v62 }
 0x2cf   :  { %v499_v16 = vor.u32 67108864, %v498_v14 }
 0x2d1   :  { %vm500_vm7 = vcmp.ge.s32.totalorder %v1441_v30, %v499_v16  ;;  %vm501_vm8 = vcmp.ge.s32.totalorder %v1445_v31, %v499_v16 }
 0x2d2   :  { %v1110_v17 = vsel %vm500_vm7, 1.0, %v1272_v9  ;;  %v1111_v18 = vsel %vm501_vm8, 1.0, %v1272_v9 }
 0x2d3   :  { %v506_v19 = vsel %vm86_vm3, %v1110_v17, 0.0  ;;  %v507_v20 = vsel %vm86_vm3, %v1111_v18, 0.0 }
 0x2d4   :  { %v508_v21 = vadd.f32 %v507_v20, %v506_v19 }
 0x2d6   :  { %509 = vadd.xlane.f32.xlu1 %v508_v21 }
 0x363   :  { %v510_v22 = vpop.xlane.xlu1 %509 }
 0x364   :  { %vm511_vm9 = vcmp.ge.f32.partialorder %v510_v22, %v1456_v42 }
 0x365   :  { %v512_v2 = vsel %vm511_vm9, %v499_v16, %v498_v14 }
 0x366   :  { %v513_v23 = vor.u32 33554432, %v512_v2 }
 0x368   :  { %vm514_vm10 = vcmp.ge.s32.totalorder %v1441_v30, %v513_v23  ;;  %vm515_vm11 = vcmp.ge.s32.totalorder %v1445_v31, %v513_v23 }
 0x369   :  { %v1112_v25 = vsel %vm514_vm10, 1.0, %v1272_v9  ;;  %v1113_v26 = vsel %vm515_vm11, 1.0, %v1272_v9 }
 0x36a   :  { %v520_v27 = vsel %vm86_vm3, %v1112_v25, 0.0  ;;  %v521_v3 = vsel %vm86_vm3, %v1113_v26, 0.0 }
 0x36b   :  { %v522_v34 = vadd.f32 %v521_v3, %v520_v27 }
 0x36d   :  { %523 = vadd.xlane.f32.xlu0 %v522_v34 }
 0x3fa   :  { %v524_v28 = vpop.xlane.xlu0 %523 }
 0x3fb   :  { %vm525_vm12 = vcmp.ge.f32.partialorder %v524_v28, %v1456_v42 }
 0x3fc   :  { %v526_v29 = vsel %vm525_vm12, %v513_v23, %v512_v2 }
 0x3fd   :  { %v527_v35 = vor.u32 16777216, %v526_v29 }
 0x3ff   :  { %vm528_vm13 = vcmp.ge.s32.totalorder %v1441_v30, %v527_v35  ;;  %vm529_vm14 = vcmp.ge.s32.totalorder %v1445_v31, %v527_v35 }
 0x400   :  { %v1114_v36 = vsel %vm528_vm13, 1.0, %v1272_v9  ;;  %v1115_v33 = vsel %vm529_vm14, 1.0, %v1272_v9 }
 0x401   :  { %v534_v41 = vsel %vm86_vm3, %v1114_v36, 0.0  ;;  %v535_v8 = vsel %vm86_vm3, %v1115_v33, 0.0 }
 0x402   :  { %v536_v32 = vadd.f32 %v535_v8, %v534_v41 }
 0x404   :  { %537 = vadd.xlane.f32.xlu1 %v536_v32 }
 0x491   :  { %v538_v37 = vpop.xlane.xlu1 %537 }
 0x492   :  { %vm539_vm15 = vcmp.ge.f32.partialorder %v538_v37, %v1456_v42 }
 0x493   :  { %v540_v43 = vsel %vm539_vm15, %v527_v35, %v526_v29 }
 0x494   :  { %v541_v38 = vor.u32 8388608, %v540_v43 }
 0x496   :  { %vm542_vm1 = vcmp.ge.s32.totalorder %v1441_v30, %v541_v38  ;;  %vm543_vm2 = vcmp.ge.s32.totalorder %v1445_v31, %v541_v38 }
 0x497   :  { %v1116_v11 = vsel %vm542_vm1, 1.0, %v1272_v9  ;;  %v1117_v44 = vsel %vm543_vm2, 1.0, %v1272_v9 }
 0x498   :  { %v548_v46 = vsel %vm86_vm3, %v1116_v11, 0.0  ;;  %v549_v47 = vsel %vm86_vm3, %v1117_v44, 0.0 }
 0x499   :  { %v550_v48 = vadd.f32 %v549_v47, %v548_v46 }
 0x49b   :  { %551 = vadd.xlane.f32.xlu0 %v550_v48 }
 0x528   :  { %v552_v49 = vpop.xlane.xlu0 %551 }
 0x529   :  { %vm553_vm4 = vcmp.ge.f32.partialorder %v552_v49, %v1456_v42 }
 0x52a   :  { %v554_v50 = vsel %vm553_vm4, %v541_v38, %v540_v43 }
 0x52b   :  { %v555_v51 = vor.u32 4194304, %v554_v50 }
 0x52d   :  { %vm556_vm5 = vcmp.ge.s32.totalorder %v1441_v30, %v555_v51  ;;  %vm557_vm6 = vcmp.ge.s32.totalorder %v1445_v31, %v555_v51 }
 0x52e   :  { %v1118_v52 = vsel %vm556_vm5, 1.0, %v1272_v9  ;;  %v1119_v53 = vsel %vm557_vm6, 1.0, %v1272_v9 }
 0x52f   :  { %v562_v54 = vsel %vm86_vm3, %v1118_v52, 0.0  ;;  %v563_v55 = vsel %vm86_vm3, %v1119_v53, 0.0 }
 0x530   :  { %v564_v56 = vadd.f32 %v563_v55, %v562_v54 }
 0x532   :  { %565 = vadd.xlane.f32.xlu1 %v564_v56 }
 0x5bf   :  { %v566_v57 = vpop.xlane.xlu1 %565 }
 0x5c0   :  { %vm567_vm7 = vcmp.ge.f32.partialorder %v566_v57, %v1456_v42 }
 0x5c1   :  { %v568_v58 = vsel %vm567_vm7, %v555_v51, %v554_v50 }
 0x5c2   :  { %v569_v59 = vor.u32 2097152, %v568_v58 }
 0x5c4   :  { %vm570_vm8 = vcmp.ge.s32.totalorder %v1441_v30, %v569_v59  ;;  %vm571_vm9 = vcmp.ge.s32.totalorder %v1445_v31, %v569_v59 }
 0x5c5   :  { %v1120_v60 = vsel %vm570_vm8, 1.0, %v1272_v9  ;;  %v1121_v61 = vsel %vm571_vm9, 1.0, %v1272_v9 }
 0x5c6   :  { %v576_v62 = vsel %vm86_vm3, %v1120_v60, 0.0  ;;  %v577_v63 = vsel %vm86_vm3, %v1121_v61, 0.0 }
 0x5c7   :  { %v578_v5 = vadd.f32 %v577_v63, %v576_v62 }
 0x5c9   :  { %579 = vadd.xlane.f32.xlu0 %v578_v5 }
 0x656   :  { %v580_v6 = vpop.xlane.xlu0 %579 }
 0x657   :  { %vm581_vm10 = vcmp.ge.f32.partialorder %v580_v6, %v1456_v42 }
 0x658   :  { %v582_v1 = vsel %vm581_vm10, %v569_v59, %v568_v58 }
 0x659   :  { %v583_v12 = vor.u32 1048576, %v582_v1 }
 0x65b   :  { %vm584_vm11 = vcmp.ge.s32.totalorder %v1441_v30, %v583_v12  ;;  %vm585_vm12 = vcmp.ge.s32.totalorder %v1445_v31, %v583_v12 }
 0x65c   :  { %v1122_v7 = vsel %vm584_vm11, 1.0, %v1272_v9  ;;  %v1123_v13 = vsel %vm585_vm12, 1.0, %v1272_v9 }
 0x65d   :  { %v590_v14 = vsel %vm86_vm3, %v1122_v7, 0.0  ;;  %v591_v16 = vsel %vm86_vm3, %v1123_v13, 0.0 }
 0x65e   :  { %v592_v17 = vadd.f32 %v591_v16, %v590_v14 }
 0x660   :  { %593 = vadd.xlane.f32.xlu1 %v592_v17 }
 0x6ed   :  { %v594_v18 = vpop.xlane.xlu1 %593 }
 0x6ee   :  { %vm595_vm13 = vcmp.ge.f32.partialorder %v594_v18, %v1456_v42 }
 0x6ef   :  { %v596_v19 = vsel %vm595_vm13, %v583_v12, %v582_v1 }
 0x6f0   :  { %v597_v20 = vor.u32 524288, %v596_v19 }
 0x6f2   :  { %vm598_vm14 = vcmp.ge.s32.totalorder %v1441_v30, %v597_v20  ;;  %vm599_vm15 = vcmp.ge.s32.totalorder %v1445_v31, %v597_v20 }
 0x6f3   :  { %v1124_v21 = vsel %vm598_vm14, 1.0, %v1272_v9  ;;  %v1125_v22 = vsel %vm599_vm15, 1.0, %v1272_v9 }
 0x6f4   :  { %v604_v2 = vsel %vm86_vm3, %v1124_v21, 0.0  ;;  %v605_v23 = vsel %vm86_vm3, %v1125_v22, 0.0 }
 0x6f5   :  { %v606_v25 = vadd.f32 %v605_v23, %v604_v2 }
 0x6f7   :  { %607 = vadd.xlane.f32.xlu0 %v606_v25 }
 0x784   :  { %v608_v26 = vpop.xlane.xlu0 %607 }
 0x785   :  { %vm609_vm1 = vcmp.ge.f32.partialorder %v608_v26, %v1456_v42 }
 0x786   :  { %v610_v27 = vsel %vm609_vm1, %v597_v20, %v596_v19 }
 0x787   :  { %v611_v3 = vor.u32 262144, %v610_v27 }
 0x789   :  { %vm612_vm2 = vcmp.ge.s32.totalorder %v1441_v30, %v611_v3  ;;  %vm613_vm4 = vcmp.ge.s32.totalorder %v1445_v31, %v611_v3 }
 0x78a   :  { %v1126_v34 = vsel %vm612_vm2, 1.0, %v1272_v9  ;;  %v1127_v28 = vsel %vm613_vm4, 1.0, %v1272_v9 }
 0x78b   :  { %v618_v29 = vsel %vm86_vm3, %v1126_v34, 0.0  ;;  %v619_v35 = vsel %vm86_vm3, %v1127_v28, 0.0 }
 0x78c   :  { %v620_v36 = vadd.f32 %v619_v35, %v618_v29 }
 0x78e   :  { %621 = vadd.xlane.f32.xlu1 %v620_v36 }
 0x81b   :  { %v622_v33 = vpop.xlane.xlu1 %621 }
 0x81c   :  { %vm623_vm5 = vcmp.ge.f32.partialorder %v622_v33, %v1456_v42 }
 0x81d   :  { %v624_v41 = vsel %vm623_vm5, %v611_v3, %v610_v27 }
 0x81e   :  { %v625_v8 = vor.u32 131072, %v624_v41 }
 0x820   :  { %vm626_vm6 = vcmp.ge.s32.totalorder %v1441_v30, %v625_v8  ;;  %vm627_vm7 = vcmp.ge.s32.totalorder %v1445_v31, %v625_v8 }
 0x821   :  { %v1128_v32 = vsel %vm626_vm6, 1.0, %v1272_v9  ;;  %v1129_v37 = vsel %vm627_vm7, 1.0, %v1272_v9 }
 0x822   :  { %v632_v43 = vsel %vm86_vm3, %v1128_v32, 0.0  ;;  %v633_v38 = vsel %vm86_vm3, %v1129_v37, 0.0 }
 0x823   :  { %v634_v11 = vadd.f32 %v633_v38, %v632_v43 }
 0x825   :  { %635 = vadd.xlane.f32.xlu0 %v634_v11 }
 0x8b2   :  { %v636_v44 = vpop.xlane.xlu0 %635 }
 0x8b3   :  { %vm637_vm8 = vcmp.ge.f32.partialorder %v636_v44, %v1456_v42 }
 0x8b4   :  { %v638_v46 = vsel %vm637_vm8, %v625_v8, %v624_v41 }
 0x8b5   :  { %v639_v47 = vor.u32 65536, %v638_v46 }
 0x8b7   :  { %vm640_vm9 = vcmp.ge.s32.totalorder %v1441_v30, %v639_v47  ;;  %vm641_vm10 = vcmp.ge.s32.totalorder %v1445_v31, %v639_v47 }
 0x8b8   :  { %v1130_v48 = vsel %vm640_vm9, 1.0, %v1272_v9  ;;  %v1131_v49 = vsel %vm641_vm10, 1.0, %v1272_v9 }
 0x8b9   :  { %v646_v50 = vsel %vm86_vm3, %v1130_v48, 0.0  ;;  %v647_v51 = vsel %vm86_vm3, %v1131_v49, 0.0 }
 0x8ba   :  { %v648_v52 = vadd.f32 %v647_v51, %v646_v50 }
 0x8bc   :  { %649 = vadd.xlane.f32.xlu1 %v648_v52 }
 0x949   :  { %v650_v53 = vpop.xlane.xlu1 %649 }
 0x94a   :  { %vm651_vm11 = vcmp.ge.f32.partialorder %v650_v53, %v1456_v42 }
 0x94b   :  { %v652_v54 = vsel %vm651_vm11, %v639_v47, %v638_v46 }
 0x94c   :  { %v653_v55 = vor.u32 32768, %v652_v54 }
 0x94e   :  { %vm654_vm12 = vcmp.ge.s32.totalorder %v1441_v30, %v653_v55  ;;  %vm655_vm13 = vcmp.ge.s32.totalorder %v1445_v31, %v653_v55 }
 0x94f   :  { %v1132_v56 = vsel %vm654_vm12, 1.0, %v1272_v9  ;;  %v1133_v57 = vsel %vm655_vm13, 1.0, %v1272_v9 }
 0x950   :  { %v660_v58 = vsel %vm86_vm3, %v1132_v56, 0.0  ;;  %v661_v59 = vsel %vm86_vm3, %v1133_v57, 0.0 }
 0x951   :  { %v662_v60 = vadd.f32 %v661_v59, %v660_v58 }
 0x953   :  { %663 = vadd.xlane.f32.xlu0 %v662_v60 }
 0x9e0   :  { %v664_v61 = vpop.xlane.xlu0 %663 }
 0x9e1   :  { %vm665_vm14 = vcmp.ge.f32.partialorder %v664_v61, %v1456_v42 }
 0x9e2   :  { %v666_v62 = vsel %vm665_vm14, %v653_v55, %v652_v54 }
 0x9e3   :  { %v667_v63 = vor.u32 16384, %v666_v62 }
 0x9e5   :  { %vm668_vm15 = vcmp.ge.s32.totalorder %v1441_v30, %v667_v63  ;;  %vm669_vm1 = vcmp.ge.s32.totalorder %v1445_v31, %v667_v63 }
 0x9e6   :  { %v1134_v5 = vsel %vm668_vm15, 1.0, %v1272_v9  ;;  %v1135_v6 = vsel %vm669_vm1, 1.0, %v1272_v9 }
 0x9e7   :  { %v674_v1 = vsel %vm86_vm3, %v1134_v5, 0.0  ;;  %v675_v12 = vsel %vm86_vm3, %v1135_v6, 0.0 }
 0x9e8   :  { %v676_v7 = vadd.f32 %v675_v12, %v674_v1 }
 0x9ea   :  { %677 = vadd.xlane.f32.xlu1 %v676_v7 }
 0xa77   :  { %v678_v13 = vpop.xlane.xlu1 %677 }
 0xa78   :  { %vm679_vm2 = vcmp.ge.f32.partialorder %v678_v13, %v1456_v42 }
 0xa79   :  { %v680_v14 = vsel %vm679_vm2, %v667_v63, %v666_v62 }
 0xa7a   :  { %v681_v16 = vor.u32 8192, %v680_v14 }
 0xa7c   :  { %vm682_vm4 = vcmp.ge.s32.totalorder %v1441_v30, %v681_v16  ;;  %vm683_vm5 = vcmp.ge.s32.totalorder %v1445_v31, %v681_v16 }
 0xa7d   :  { %v1136_v17 = vsel %vm682_vm4, 1.0, %v1272_v9  ;;  %v1137_v18 = vsel %vm683_vm5, 1.0, %v1272_v9 }
 0xa7e   :  { %v688_v19 = vsel %vm86_vm3, %v1136_v17, 0.0  ;;  %v689_v20 = vsel %vm86_vm3, %v1137_v18, 0.0 }
 0xa7f   :  { %v690_v21 = vadd.f32 %v689_v20, %v688_v19 }
 0xa81   :  { %691 = vadd.xlane.f32.xlu0 %v690_v21 }
 0xb0e   :  { %v692_v22 = vpop.xlane.xlu0 %691 }
 0xb0f   :  { %vm693_vm6 = vcmp.ge.f32.partialorder %v692_v22, %v1456_v42 }
 0xb10   :  { %v694_v2 = vsel %vm693_vm6, %v681_v16, %v680_v14 }
 0xb11   :  { %v695_v23 = vor.u32 4096, %v694_v2 }
 0xb13   :  { %vm696_vm7 = vcmp.ge.s32.totalorder %v1441_v30, %v695_v23  ;;  %vm697_vm8 = vcmp.ge.s32.totalorder %v1445_v31, %v695_v23 }
 0xb14   :  { %v1138_v25 = vsel %vm696_vm7, 1.0, %v1272_v9  ;;  %v1139_v26 = vsel %vm697_vm8, 1.0, %v1272_v9 }
 0xb15   :  { %v702_v27 = vsel %vm86_vm3, %v1138_v25, 0.0  ;;  %v703_v3 = vsel %vm86_vm3, %v1139_v26, 0.0 }
 0xb16   :  { %v704_v34 = vadd.f32 %v703_v3, %v702_v27 }
 0xb18   :  { %705 = vadd.xlane.f32.xlu1 %v704_v34 }
 0xba5   :  { %v706_v28 = vpop.xlane.xlu1 %705 }
 0xba6   :  { %vm707_vm9 = vcmp.ge.f32.partialorder %v706_v28, %v1456_v42 }
 0xba7   :  { %v708_v29 = vsel %vm707_vm9, %v695_v23, %v694_v2 }
 0xba8   :  { %v709_v35 = vor.u32 2048, %v708_v29 }
 0xbaa   :  { %vm710_vm10 = vcmp.ge.s32.totalorder %v1441_v30, %v709_v35  ;;  %vm711_vm11 = vcmp.ge.s32.totalorder %v1445_v31, %v709_v35 }
 0xbab   :  { %v1140_v36 = vsel %vm710_vm10, 1.0, %v1272_v9  ;;  %v1141_v33 = vsel %vm711_vm11, 1.0, %v1272_v9 }
 0xbac   :  { %v716_v41 = vsel %vm86_vm3, %v1140_v36, 0.0  ;;  %v717_v8 = vsel %vm86_vm3, %v1141_v33, 0.0 }
 0xbad   :  { %v718_v32 = vadd.f32 %v717_v8, %v716_v41 }
 0xbaf   :  { %719 = vadd.xlane.f32.xlu0 %v718_v32 }
 0xc3c   :  { %v720_v37 = vpop.xlane.xlu0 %719 }
 0xc3d   :  { %vm721_vm12 = vcmp.ge.f32.partialorder %v720_v37, %v1456_v42 }
 0xc3e   :  { %v722_v43 = vsel %vm721_vm12, %v709_v35, %v708_v29 }
 0xc3f   :  { %v723_v38 = vor.u32 1024, %v722_v43 }
 0xc41   :  { %vm724_vm13 = vcmp.ge.s32.totalorder %v1441_v30, %v723_v38  ;;  %vm725_vm14 = vcmp.ge.s32.totalorder %v1445_v31, %v723_v38 }
 0xc42   :  { %v1142_v11 = vsel %vm724_vm13, 1.0, %v1272_v9  ;;  %v1143_v44 = vsel %vm725_vm14, 1.0, %v1272_v9 }
 0xc43   :  { %v730_v46 = vsel %vm86_vm3, %v1142_v11, 0.0  ;;  %v731_v47 = vsel %vm86_vm3, %v1143_v44, 0.0 }
 0xc44   :  { %v732_v48 = vadd.f32 %v731_v47, %v730_v46 }
 0xc46   :  { %733 = vadd.xlane.f32.xlu1 %v732_v48 }
 0xcd3   :  { %v734_v49 = vpop.xlane.xlu1 %733 }
 0xcd4   :  { %vm735_vm15 = vcmp.ge.f32.partialorder %v734_v49, %v1456_v42 }
 0xcd5   :  { %v736_v50 = vsel %vm735_vm15, %v723_v38, %v722_v43 }
 0xcd6   :  { %v737_v51 = vor.u32 512, %v736_v50 }
 0xcd8   :  { %vm738_vm1 = vcmp.ge.s32.totalorder %v1441_v30, %v737_v51  ;;  %vm739_vm2 = vcmp.ge.s32.totalorder %v1445_v31, %v737_v51 }
 0xcd9   :  { %v1144_v52 = vsel %vm738_vm1, 1.0, %v1272_v9  ;;  %v1145_v53 = vsel %vm739_vm2, 1.0, %v1272_v9 }
 0xcda   :  { %v744_v54 = vsel %vm86_vm3, %v1144_v52, 0.0  ;;  %v745_v55 = vsel %vm86_vm3, %v1145_v53, 0.0 }
 0xcdb   :  { %v746_v56 = vadd.f32 %v745_v55, %v744_v54 }
 0xcdd   :  { %747 = vadd.xlane.f32.xlu0 %v746_v56 }
 0xd6a   :  { %v748_v57 = vpop.xlane.xlu0 %747 }
 0xd6b   :  { %vm749_vm4 = vcmp.ge.f32.partialorder %v748_v57, %v1456_v42 }
 0xd6c   :  { %v750_v58 = vsel %vm749_vm4, %v737_v51, %v736_v50 }
 0xd6d   :  { %v751_v59 = vor.u32 256, %v750_v58 }
 0xd6f   :  { %vm752_vm5 = vcmp.ge.s32.totalorder %v1441_v30, %v751_v59  ;;  %vm753_vm6 = vcmp.ge.s32.totalorder %v1445_v31, %v751_v59 }
 0xd70   :  { %v1146_v60 = vsel %vm752_vm5, 1.0, %v1272_v9  ;;  %v1147_v61 = vsel %vm753_vm6, 1.0, %v1272_v9 }
 0xd71   :  { %v758_v62 = vsel %vm86_vm3, %v1146_v60, 0.0  ;;  %v759_v63 = vsel %vm86_vm3, %v1147_v61, 0.0 }
 0xd72   :  { %v760_v5 = vadd.f32 %v759_v63, %v758_v62 }
 0xd74   :  { %761 = vadd.xlane.f32.xlu1 %v760_v5 }
 0xe01   :  { %v762_v6 = vpop.xlane.xlu1 %761 }
 0xe02   :  { %vm763_vm7 = vcmp.ge.f32.partialorder %v762_v6, %v1456_v42 }
 0xe03   :  { %v764_v1 = vsel %vm763_vm7, %v751_v59, %v750_v58 }
 0xe04   :  { %v765_v12 = vor.u32 128, %v764_v1 }
 0xe06   :  { %vm766_vm8 = vcmp.ge.s32.totalorder %v1441_v30, %v765_v12  ;;  %vm767_vm9 = vcmp.ge.s32.totalorder %v1445_v31, %v765_v12 }
 0xe07   :  { %v1148_v7 = vsel %vm766_vm8, 1.0, %v1272_v9  ;;  %v1149_v13 = vsel %vm767_vm9, 1.0, %v1272_v9 }
 0xe08   :  { %v772_v14 = vsel %vm86_vm3, %v1148_v7, 0.0  ;;  %v773_v16 = vsel %vm86_vm3, %v1149_v13, 0.0 }
 0xe09   :  { %v774_v17 = vadd.f32 %v773_v16, %v772_v14 }
 0xe0b   :  { %775 = vadd.xlane.f32.xlu0 %v774_v17 }
 0xe98   :  { %v776_v18 = vpop.xlane.xlu0 %775 }
 0xe99   :  { %vm777_vm10 = vcmp.ge.f32.partialorder %v776_v18, %v1456_v42 }
 0xe9a   :  { %v778_v19 = vsel %vm777_vm10, %v765_v12, %v764_v1 }
 0xe9b   :  { %v779_v20 = vor.u32 64, %v778_v19 }
 0xe9d   :  { %vm780_vm11 = vcmp.ge.s32.totalorder %v1441_v30, %v779_v20  ;;  %vm781_vm12 = vcmp.ge.s32.totalorder %v1445_v31, %v779_v20 }
 0xe9e   :  { %v1150_v21 = vsel %vm780_vm11, 1.0, %v1272_v9  ;;  %v1151_v22 = vsel %vm781_vm12, 1.0, %v1272_v9 }
 0xe9f   :  { %v786_v2 = vsel %vm86_vm3, %v1150_v21, 0.0  ;;  %v787_v23 = vsel %vm86_vm3, %v1151_v22, 0.0 }
 0xea0   :  { %v788_v25 = vadd.f32 %v787_v23, %v786_v2  ;;  %v1218_v23 = vld [vmem:[#allocation2] sm:$0xf] }
 0xea2   :  { %789 = vadd.xlane.f32.xlu1 %v788_v25 }
 0xf2f   :  { %v790_v26 = vpop.xlane.xlu1 %789 }
 0xf30   :  { %vm791_vm13 = vcmp.ge.f32.partialorder %v790_v26, %v1456_v42 }
 0xf31   :  { %v792_v27 = vsel %vm791_vm13, %v779_v20, %v778_v19 }
 0xf32   :  { %v793_v3 = vor.u32 32, %v792_v27 }
 0xf34   :  { %vm794_vm14 = vcmp.ge.s32.totalorder %v1441_v30, %v793_v3  ;;  %vm795_vm15 = vcmp.ge.s32.totalorder %v1445_v31, %v793_v3 }
 0xf35   :  { %v1152_v34 = vsel %vm794_vm14, 1.0, %v1272_v9  ;;  %v1153_v28 = vsel %vm795_vm15, 1.0, %v1272_v9 }
 0xf36   :  { %v800_v29 = vsel %vm86_vm3, %v1152_v34, 0.0  ;;  %v801_v35 = vsel %vm86_vm3, %v1153_v28, 0.0 }
 0xf37   :  { %v802_v36 = vadd.f32 %v801_v35, %v800_v29  ;;  %v1697_v35 = vand.u32 127, %v50_v0 }
 0xf39   :  { %803 = vadd.xlane.f32.xlu0 %v802_v36 }
 0xfc6   :  { %v804_v33 = vpop.xlane.xlu0 %803 }
 0xfc7   :  { %vm805_vm1 = vcmp.ge.f32.partialorder %v804_v33, %v1456_v42 }
 0xfc8   :  { %v806_v41 = vsel %vm805_vm1, %v793_v3, %v792_v27 }
 0xfc9   :  { %v807_v8 = vor.u32 16, %v806_v41 }
 0xfcb   :  { %vm808_vm2 = vcmp.ge.s32.totalorder %v1441_v30, %v807_v8  ;;  %vm809_vm4 = vcmp.ge.s32.totalorder %v1445_v31, %v807_v8 }
 0xfcc   :  { %v1154_v32 = vsel %vm808_vm2, 1.0, %v1272_v9  ;;  %v1155_v37 = vsel %vm809_vm4, 1.0, %v1272_v9 }
 0xfcd   :  { %v814_v43 = vsel %vm86_vm3, %v1154_v32, 0.0  ;;  %v815_v38 = vsel %vm86_vm3, %v1155_v37, 0.0 }
 0xfce   :  { %v816_v11 = vadd.f32 %v815_v38, %v814_v43 }
 0xfd0   :  { %817 = vadd.xlane.f32.xlu1 %v816_v11 }
0x105d   :  { %v818_v44 = vpop.xlane.xlu1 %817 }
0x105e   :  { %vm819_vm5 = vcmp.ge.f32.partialorder %v818_v44, %v1456_v42 }
0x105f   :  { %v820_v46 = vsel %vm819_vm5, %v807_v8, %v806_v41  ;;  %v1703_v8 = vadd.s32 128, %v1697_v35 }
0x1060   :  { %v821_v47 = vor.u32 8, %v820_v46 }
0x1062   :  { %vm822_vm6 = vcmp.ge.s32.totalorder %v1441_v30, %v821_v47  ;;  %vm823_vm7 = vcmp.ge.s32.totalorder %v1445_v31, %v821_v47 }
0x1063   :  { %v1156_v48 = vsel %vm822_vm6, 1.0, %v1272_v9  ;;  %v1157_v49 = vsel %vm823_vm7, 1.0, %v1272_v9 }
0x1064   :  { %v828_v50 = vsel %vm86_vm3, %v1156_v48, 0.0  ;;  %v829_v51 = vsel %vm86_vm3, %v1157_v49, 0.0 }
0x1065   :  { %v830_v52 = vadd.f32 %v829_v51, %v828_v50 }
0x1067   :  { %831 = vadd.xlane.f32.xlu0 %v830_v52 }
0x10f4   :  { %v832_v53 = vpop.xlane.xlu0 %831 }
0x10f5   :  { %vm833_vm8 = vcmp.ge.f32.partialorder %v832_v53, %v1456_v42 }
0x10f6   :  { %v834_v54 = vsel %vm833_vm8, %v821_v47, %v820_v46 }
0x10f7   :  { %v835_v55 = vor.u32 4, %v834_v54 }
0x10f9   :  { %vm836_vm9 = vcmp.ge.s32.totalorder %v1441_v30, %v835_v55  ;;  %vm837_vm10 = vcmp.ge.s32.totalorder %v1445_v31, %v835_v55 }
0x10fa   :  { %v1158_v56 = vsel %vm836_vm9, 1.0, %v1272_v9  ;;  %v1159_v57 = vsel %vm837_vm10, 1.0, %v1272_v9 }
0x10fb   :  { %v842_v58 = vsel %vm86_vm3, %v1158_v56, 0.0  ;;  %v843_v59 = vsel %vm86_vm3, %v1159_v57, 0.0 }
0x10fc   :  { %v844_v60 = vadd.f32 %v843_v59, %v842_v58 }
0x10fe   :  { %845 = vadd.xlane.f32.xlu1 %v844_v60 }
0x118b   :  { %v846_v61 = vpop.xlane.xlu1 %845 }
0x118c   :  { %vm847_vm11 = vcmp.ge.f32.partialorder %v846_v61, %v1456_v42 }
0x118d   :  { %v848_v62 = vsel %vm847_vm11, %v835_v55, %v834_v54 }
0x118e   :  { %v849_v63 = vor.u32 2, %v848_v62 }
0x1190   :  { %vm850_vm12 = vcmp.ge.s32.totalorder %v1441_v30, %v849_v63  ;;  %vm851_vm13 = vcmp.ge.s32.totalorder %v1445_v31, %v849_v63 }
0x1191   :  { %v1160_v5 = vsel %vm850_vm12, 1.0, %v1272_v9  ;;  %v1161_v6 = vsel %vm851_vm13, 1.0, %v1272_v9 }
0x1192   :  { %v856_v1 = vsel %vm86_vm3, %v1160_v5, 0.0  ;;  %v857_v12 = vsel %vm86_vm3, %v1161_v6, 0.0 }
0x1193   :  { %v858_v7 = vadd.f32 %v857_v12, %v856_v1 }
0x1195   :  { %859 = vadd.xlane.f32.xlu0 %v858_v7 }
0x1222   :  { %v860_v13 = vpop.xlane.xlu0 %859 }
0x1223   :  { %vm861_vm14 = vcmp.ge.f32.partialorder %v860_v13, %v1456_v42 }
0x1224   :  { %v862_v14 = vsel %vm861_vm14, %v849_v63, %v848_v62 }
0x1225   :  { %v863_v16 = vor.u32 1, %v862_v14 }
0x1227   :  { %vm864_vm15 = vcmp.ge.s32.totalorder %v1441_v30, %v863_v16  ;;  %vm865_vm1 = vcmp.ge.s32.totalorder %v1445_v31, %v863_v16 }
0x1228   :  { %v1162_v17 = vsel %vm864_vm15, 1.0, %v1272_v9  ;;  %v1163_v18 = vsel %vm865_vm1, 1.0, %v1272_v9 }
0x1229   :  { %v870_v19 = vsel %vm86_vm3, %v1162_v17, 0.0  ;;  %v871_v20 = vsel %vm86_vm3, %v1163_v18, 0.0 }
0x122a   :  { %v872_v21 = vadd.f32 %v871_v20, %v870_v19 }
0x122c   :  { %873 = vadd.xlane.f32.xlu1 %v872_v21 }
0x12b9   :  { %v874_v22 = vpop.xlane.xlu1 %873 }
0x12ba   :  { %vm875_vm2 = vcmp.ge.f32.partialorder %v874_v22, %v1456_v42 }
0x12bb   :  { %v1670_v2 = vsel %vm875_vm2, %v863_v16, %v862_v14 }
0x12bc   :  { %vm1674_vm4 = vcmp.eq.s32.totalorder %v1441_v30, %v1670_v2  ;;  %vm877_vm5 = vcmp.gt.s32.totalorder %v1441_v30, %v1670_v2  ;;  %vm878_vm6 = vcmp.gt.s32.totalorder %v1445_v31, %v1670_v2  ;;  %vm1711_vm10 = vcmp.eq.s32.totalorder %v1445_v31, %v1670_v2 }
0x12bd   :  { %v1166_v25 = vsel %vm1674_vm4, 1.0, %v1272_v9  ;;  %v1164_v26 = vsel %vm877_vm5, 1.0, %v1272_v9  ;;  %v1165_v27 = vsel %vm878_vm6, 1.0, %v1272_v9  ;;  %v1081_v2 = vmax.f32 %v1453_v39, 1e-06 }
0x12be   :  { %v902_v3 = vsel %vm86_vm3, %v1166_v25, 0.0  ;;  %v883_v34 = vsel %vm86_vm3, %v1164_v26, 0.0  ;;  %v884_v28 = vsel %vm86_vm3, %v1165_v27, 0.0 }
0x12bf   :  { %905 = vadd.xlane.f32.xlu1 %v902_v3  ;;  %v885_v29 = vadd.f32 %v884_v28, %v883_v34 }
0x12c1   :  { %886 = vadd.xlane.f32.xlu0 %v885_v29 }
0x134c   :  { %v906_v41 = vpop.xlane.xlu1 %905 }
0x134e   :  { %v887_v36 = vpop.xlane.xlu0 %886 }
0x134f   :  { %v1700_v33 = vsub.f32 %v1456_v42, %v887_v36  ;;  %v53_v36 = vld [vmem:[#allocation5] sm:$0xff] }
0x1350   :  { %1212 = vlog2.f32 %v53_v36 }
0x1351   :  { %vm907_vm7 = vcmp.lt.f32.partialorder %v906_v41, %v1700_v33  ;;  %v239_v41 = vld [vmem:[#allocation5 + $0x8] sm:$0xff] }
0x1352   :  { %v908_v32 = vsel %vm907_vm7, 128, %v1275_v45  ;;  %1214 = vlog2.f32 %v239_v41 }
0x1353   :  { %v909_v37 = vor.u32 64, %v908_v32  ;;  %1216 = vrcp.f32 %v1081_v2 }
0x1355   :  { %vm910_vm8 = vcmp.lt.s32.totalorder %v1697_v35, %v909_v37  ;;  %vm911_vm9 = vcmp.lt.s32.totalorder %v1703_v8, %v909_v37 }
0x1356   :  { %vm912_vm11 = vmand %vm1674_vm4, %vm910_vm8 }
0x1357   :  { %vm913_vm12 = vmand %vm1711_vm10, %vm911_vm9  ;;  %v1167_v42 = vsel %vm912_vm11, 1.0, %v1272_v9 }
0x1358   :  { %v1168_v45 = vsel %vm913_vm12, 1.0, %v1272_v9  ;;  %v918_v43 = vsel %vm86_vm3, %v1167_v42, 0.0  ;;  %v1193_v42 = vld [vmem:[%s1853_s4] ss:$8 sps:$4 sm:$0xff]  }
0x1359   :  { %v919_v38 = vsel %vm86_vm3, %v1168_v45, 0.0 }
0x135a   :  { %v920_v11 = vadd.f32 %v919_v38, %v918_v43  ;;  %v1195_v43 = vld [vmem:[%s1853_s4 + $0x4] ss:$8 sps:$4 sm:$0x33]  }
0x135c   :  { %921 = vadd.xlane.f32.xlu0 %v920_v11  ;;  %v65_v11 = vrot.slane %v1193_v42, 6 }
0x13e9   :  { %v922_v44 = vpop.xlane.xlu0 %921 }
0x13ea   :  { %vm923_vm13 = vcmp.lt.f32.partialorder %v922_v44, %v1700_v33 }
0x13eb   :  { %v924_v46 = vsel %vm923_vm13, %v909_v37, %v908_v32  ;;  %v1213_v32 = vpop.eup %1212 }
0x13ec   :  { %v925_v47 = vor.u32 32, %v924_v46  ;;  %v1215_v37 = vpop.eup %1214  ;;  %v70_v45 = vmul.f32 0.6931472, %v1213_v32 }
0x13ed   :  { %v251_v38 = vmul.f32 0.6931472, %v1215_v37 }
0x13ee   :  { %vm926_vm14 = vcmp.lt.s32.totalorder %v1697_v35, %v925_v47  ;;  %vm927_vm15 = vcmp.lt.s32.totalorder %v1703_v8, %v925_v47  ;;  %v71_v44 = vmul.f32 5.0, %v70_v45 }
0x13ef   :  { %vm928_vm1 = vmand %vm1674_vm4, %vm926_vm14 }
0x13f0   :  { %vm929_vm2 = vmand %vm1711_vm10, %vm927_vm15  ;;  %v1169_v48 = vsel %vm928_vm1, 1.0, %v1272_v9 }
0x13f1   :  { %v1170_v49 = vsel %vm929_vm2, 1.0, %v1272_v9  ;;  %v934_v50 = vsel %vm86_vm3, %v1169_v48, 0.0 }
0x13f2   :  { %v935_v51 = vsel %vm86_vm3, %v1170_v49, 0.0  ;;  %v64_v49 = vmul.f32 %v1193_v42, %v53_v36 }
0x13f3   :  { %v936_v52 = vadd.f32 %v935_v51, %v934_v50  ;;  %v66_v50 = vrot.slane %v65_v11, 4  ;;  %v248_v51 = vmul.f32 %v1193_v42, %v239_v41 }
0x13f5   :  { %937 = vadd.xlane.f32.xlu1 %v936_v52  ;;  %v54_v52 = vld [vmem:[#allocation7] sm:$0xff] }
0x1482   :  { %v938_v53 = vpop.xlane.xlu1 %937 }
0x1483   :  { %vm939_vm7 = vcmp.lt.f32.partialorder %v938_v53, %v1700_v33 }
0x1484   :  { %v940_v54 = vsel %vm939_vm7, %v925_v47, %v924_v46  ;;  %v73_v46 = vrot.slane %v1195_v43, 6  ;;  %v252_v47 = vmul.f32 5.0, %v251_v38 }
0x1485   :  { %v941_v55 = vor.u32 16, %v940_v54 }
0x1486   :  { %v75_v53 = vsub.f32 %v71_v44, %v73_v46 }
0x1487   :  { %vm942_vm8 = vcmp.lt.s32.totalorder %v1697_v35, %v941_v55  ;;  %vm943_vm9 = vcmp.lt.s32.totalorder %v1703_v8, %v941_v55 }
0x1488   :  { %vm944_vm11 = vmand %vm1674_vm4, %vm942_vm8 }
0x1489   :  { %vm945_vm12 = vmand %vm1711_vm10, %vm943_vm9  ;;  %v1171_v56 = vsel %vm944_vm11, 1.0, %v1272_v9 }
0x148a   :  { %v1172_v57 = vsel %vm945_vm12, 1.0, %v1272_v9  ;;  %v950_v58 = vsel %vm86_vm3, %v1171_v56, 0.0 }
0x148b   :  { %v951_v59 = vsel %vm86_vm3, %v1172_v57, 0.0  ;;  %v68_v57 = vsub.f32 %v64_v49, %v66_v50 }
0x148c   :  { %v952_v60 = vadd.f32 %v951_v59, %v950_v58  ;;  %v249_v58 = vsub.f32 %v248_v51, %v66_v50 }
0x148e   :  { %953 = vadd.xlane.f32.xlu0 %v952_v60  ;;  %v101_v60 = vsub.f32 %v54_v52, %v75_v53 }
0x151b   :  { %v954_v61 = vpop.xlane.xlu0 %953 }
0x151c   :  { %vm955_vm13 = vcmp.lt.f32.partialorder %v954_v61, %v1700_v33 }
0x151d   :  { %v956_v62 = vsel %vm955_vm13, %v941_v55, %v940_v54  ;;  %v241_v54 = vld [vmem:[#allocation7 + $0x8] sm:$0xff]  ;;  %v253_v55 = vsub.f32 %v252_v47, %v73_v46 }
0x151e   :  { %v957_v63 = vor.u32 8, %v956_v62 }
0x151f   :  { %v278_v61 = vsub.f32 %v241_v54, %v253_v55 }
0x1520   :  { %vm958_vm14 = vcmp.lt.s32.totalorder %v1697_v35, %v957_v63  ;;  %vm959_vm15 = vcmp.lt.s32.totalorder %v1703_v8, %v957_v63 }
0x1521   :  { %vm960_vm1 = vmand %vm1674_vm4, %vm958_vm14 }
0x1522   :  { %vm961_vm2 = vmand %vm1711_vm10, %vm959_vm15  ;;  %v1173_v5 = vsel %vm960_vm1, 1.0, %v1272_v9 }
0x1523   :  { %v1174_v6 = vsel %vm961_vm2, 1.0, %v1272_v9  ;;  %v966_v1 = vsel %vm86_vm3, %v1173_v5, 0.0  ;;  %v102_v5 = vand.u32 2147483647, %v101_v60 }
0x1524   :  { %v967_v12 = vsel %vm86_vm3, %v1174_v6, 0.0  ;;  %v279_v6 = vand.u32 2147483647, %v278_v61 }
0x1525   :  { %v968_v7 = vadd.f32 %v967_v12, %v966_v1 }
0x1526   :  { %v1101_v45 = vadd.f32 -0.5, %v279_v6 }
0x1527   :  { %969 = vadd.xlane.f32.xlu1 %v968_v7 }
0x15b4   :  { %v970_v13 = vpop.xlane.xlu1 %969 }
0x15b5   :  { %vm971_vm7 = vcmp.lt.f32.partialorder %v970_v13, %v1700_v33  ;;  %v104_v13 = vmul.f32 0.5, %v102_v5 }
0x15b6   :  { %v972_v14 = vsel %vm971_vm7, %v957_v63, %v956_v62  ;;  %v76_v62 = vsub.f32 %v54_v52, %v68_v57  ;;  %v254_v63 = vsub.f32 %v241_v54, %v249_v58 }
0x15b7   :  { %v973_v16 = vor.u32 4, %v972_v14 }
0x15b8   :  { %v77_v1 = vand.u32 2147483647, %v76_v62  ;;  %v255_v12 = vand.u32 2147483647, %v254_v63 }
0x15b9   :  { %vm974_vm8 = vcmp.lt.s32.totalorder %v1697_v35, %v973_v16  ;;  %vm975_vm9 = vcmp.lt.s32.totalorder %v1703_v8, %v973_v16 }
0x15ba   :  { %vm976_vm11 = vmand %vm1674_vm4, %vm974_vm8 }
0x15bb   :  { %vm977_vm12 = vmand %vm1711_vm10, %vm975_vm9  ;;  %v1175_v17 = vsel %vm976_vm11, 1.0, %v1272_v9 }
0x15bc   :  { %v1176_v18 = vsel %vm977_vm12, 1.0, %v1272_v9  ;;  %v982_v19 = vsel %vm86_vm3, %v1175_v17, 0.0 }
0x15bd   :  { %v983_v20 = vsel %vm86_vm3, %v1176_v18, 0.0  ;;  %v79_v18 = vmul.f32 0.5, %v77_v1 }
0x15be   :  { %v984_v21 = vadd.f32 %v983_v20, %v982_v19  ;;  %v1095_v19 = vadd.f32 -0.5, %v102_v5 }
0x15c0   :  { %985 = vadd.xlane.f32.xlu0 %v984_v21  ;;  %v105_v21 = vmul.f32 %v104_v13, %v102_v5 }
0x164d   :  { %v986_v22 = vpop.xlane.xlu0 %985 }
0x164e   :  { %vm987_vm13 = vcmp.lt.f32.partialorder %v986_v22, %v1700_v33  ;;  %v257_v22 = vmul.f32 0.5, %v255_v12 }
0x164f   :  { %v988_v25 = vsel %vm987_vm13, %v973_v16, %v972_v14  ;;  %v281_v14 = vmul.f32 0.5, %v279_v6  ;;  %vm103_vm13 = vcmp.lt.f32.partialorder %v102_v5, 1.0 }
0x1650   :  { %v989_v26 = vor.u32 2, %v988_v25 }
0x1651   :  { %v282_v41 = vmul.f32 %v281_v14, %v279_v6 }
0x1652   :  { %vm990_vm14 = vcmp.lt.s32.totalorder %v1697_v35, %v989_v26  ;;  %vm991_vm15 = vcmp.lt.s32.totalorder %v1703_v8, %v989_v26 }
0x1653   :  { %vm992_vm1 = vmand %vm1674_vm4, %vm990_vm14  ;;  %vm78_vm14 = vcmp.lt.f32.partialorder %v77_v1, 1.0 }
0x1654   :  { %vm993_vm2 = vmand %vm1711_vm10, %vm991_vm15  ;;  %v1177_v27 = vsel %vm992_vm1, 1.0, %v1272_v9  ;;  %vm256_vm15 = vcmp.lt.f32.partialorder %v255_v12, 1.0  ;;  %vm280_vm1 = vcmp.lt.f32.partialorder %v279_v6, 1.0 }
0x1655   :  { %v1178_v3 = vsel %vm993_vm2, 1.0, %v1272_v9  ;;  %v998_v34 = vsel %vm86_vm3, %v1177_v27, 0.0  ;;  %v1094_v27 = vadd.f32 -0.5, %v77_v1  ;;  %v284_v55 = vsel %vm280_vm1, %v282_v41, %v1101_v45 }
0x1656   :  { %v999_v28 = vsel %vm86_vm3, %v1178_v3, 0.0  ;;  %v1100_v3 = vadd.f32 -0.5, %v255_v12  ;;  %v286_v5 = vcombine.high %v284_v55, %v284_v55  ;;  %v287_v6 = vrot.slane %v284_v55, 2 }
0x1657   :  { %v1000_v29 = vadd.f32 %v999_v28, %v998_v34  ;;  %v107_v34 = vsel %vm103_vm13, %v105_v21, %v1095_v19  ;;  %v258_v28 = vmul.f32 %v257_v22, %v255_v12 }
0x1658   :  { %v109_v36 = vcombine.high %v107_v34, %v107_v34  ;;  %v110_v37 = vrot.slane %v107_v34, 2 }
0x1659   :  { %1001 = vadd.xlane.f32.xlu1 %v1000_v29  ;;  %v260_v42 = vsel %vm256_vm15, %v258_v28, %v1100_v3 }
0x165a   :  { %v111_v43 = vrot.slane %v109_v36, 2  ;;  %v262_v38 = vcombine.high %v260_v42, %v260_v42  ;;  %v114_v46 = vsel %vm86_vm3, %v110_v37, 0.0  ;;  %v264_v47 = vsel %vm86_vm3, %v260_v42, 0.0 }
0x165b   :  { %v115_v50 = vrot.slane %v114_v46, 4  ;;  %v265_v53 = vrot.slane %v264_v47, 4 }
0x165c   :  { %v121_v51 = vsel %vm86_vm3, %v111_v43, 0.0  ;;  %v271_v54 = vsel %vm86_vm3, %v262_v38, 0.0 }
0x165d   :  { %v122_v52 = vrot.slane %v121_v51, 4  ;;  %v116_v60 = vadd.f32 %v115_v50, %v114_v46  ;;  %v272_v61 = vrot.slane %v271_v54, 4  ;;  %v266_v63 = vadd.f32 %v265_v53, %v264_v47 }
0x165f   :  { %v123_v62 = vadd.f32 %v122_v52, %v121_v51  ;;  %v273_v13 = vadd.f32 %v272_v61, %v271_v54 }
0x1661   :  { %v124_v14 = vrot.slane %v123_v62, 2  ;;  %v274_v22 = vrot.slane %v273_v13, 2 }
0x1663   :  { %v275_v41 = vadd.f32 %v274_v22, %v273_v13 }
0x16e6   :  { %v1002_v48 = vpop.xlane.xlu1 %1001 }
0x16e7   :  { %vm1003_vm7 = vcmp.lt.f32.partialorder %v1002_v48, %v1700_v33 }
0x16e8   :  { %v1785_v56 = vsel %vm1003_vm7, %v989_v26, %v988_v25  ;;  %v80_v26 = vmul.f32 %v79_v18, %v77_v1  ;;  %v291_v18 = vsel %vm86_vm3, %v287_v6, 0.0 }
0x16e9   :  { %v1788_v59 = vor.u32 1, %v1785_v56 }
0x16ea   :  { %v82_v29 = vsel %vm78_vm14, %v80_v26, %v1094_v27  ;;  %v292_v27 = vrot.slane %v291_v18, 4 }
0x16eb   :  { %vm1006_vm8 = vcmp.lt.s32.totalorder %v1697_v35, %v1788_v59  ;;  %vm1007_vm9 = vcmp.lt.s32.totalorder %v1703_v8, %v1788_v59  ;;  %v84_v32 = vcombine.high %v82_v29, %v82_v29  ;;  %v87_v11 = vsel %vm86_vm3, %v82_v29, 0.0 }
0x16ec   :  { %vm1008_vm11 = vmand %vm1674_vm4, %vm1006_vm8  ;;  %v88_v48 = vrot.slane %v87_v11, 4 }
0x16ed   :  { %vm1009_vm12 = vmand %vm1711_vm10, %vm1007_vm9  ;;  %v1179_v7 = vsel %vm1008_vm11, 1.0, %v1272_v9  ;;  %v94_v44 = vsel %vm86_vm3, %v84_v32, 0.0  ;;  %v293_v32 = vadd.f32 %v292_v27, %v291_v18 }
0x16ee   :  { %v1180_v16 = vsel %vm1009_vm12, 1.0, %v1272_v9  ;;  %v1014_v17 = vsel %vm86_vm3, %v1179_v7, 0.0  ;;  %v95_v49 = vrot.slane %v94_v44, 4  ;;  %v89_v57 = vadd.f32 %v88_v48, %v87_v11 }
0x16ef   :  { %v1015_v20 = vsel %vm86_vm3, %v1180_v16, 0.0  ;;  %v117_v7 = vrot.slane %v116_v60, 2  ;;  %v267_v16 = vrot.slane %v266_v63, 2 }
0x16f0   :  { %v1016_v25 = vadd.f32 %v1015_v20, %v1014_v17  ;;  %v96_v58 = vadd.f32 %v95_v49, %v94_v44  ;;  %v90_v1 = vrot.slane %v89_v57, 2  ;;  %v288_v17 = vrot.slane %v286_v5, 2 }
0x16f1   :  { %v118_v21 = vadd.f32 %v117_v7, %v116_v60  ;;  %v268_v26 = vadd.f32 %v267_v16, %v266_v63  ;;  %v294_v44 = vrot.slane %v293_v32, 2  ;;  %v276_v49 = vrot.slane %v275_v41, 1 }
0x16f2   :  { %1017 = vadd.xlane.f32.xlu0 %v1016_v25  ;;  %v97_v12 = vrot.slane %v96_v58, 2  ;;  %v91_v19 = vadd.f32 %v90_v1, %v89_v57  ;;  %v125_v25 = vadd.f32 %v124_v14, %v123_v62  ;;  %v298_v3 = vsel %vm86_vm3, %v288_v17, 0.0 }
0x16f3   :  { %v119_v29 = vrot.slane %v118_v21, 1  ;;  %v299_v37 = vrot.slane %v298_v3, 4  ;;  %v269_v11 = vrot.slane %v268_v26, 1  ;;  %v295_v50 = vadd.f32 %v294_v44, %v293_v32 }
0x16f4   :  { %v98_v20 = vadd.f32 %v97_v12, %v96_v58  ;;  %v92_v34 = vrot.slane %v91_v19, 1  ;;  %v126_v36 = vrot.slane %v125_v25, 1  ;;  %v277_v58 = vadd.f32 %v276_v49, %v275_v41 }
0x16f5   :  { %v120_v43 = vadd.f32 %v119_v29, %v118_v21  ;;  %v300_v46 = vadd.f32 %v299_v37, %v298_v3  ;;  %v270_v53 = vadd.f32 %v269_v11, %v268_v26  ;;  %v296_v54 = vrot.slane %v295_v50, 1  ;;  %v1217_v29 = vpop.eup %1216 }
0x16f6   :  { %v99_v28 = vrot.slane %v98_v20, 1  ;;  %v93_v42 = vadd.f32 %v92_v34, %v91_v19  ;;  %v127_v38 = vadd.f32 %v126_v36, %v125_v25 }
0x16f7   :  { %v301_v51 = vrot.slane %v300_v46, 2  ;;  %v297_v60 = vadd.f32 %v296_v54, %v295_v50 }
0x16f8   :  { %v100_v45 = vadd.f32 %v99_v28, %v98_v20  ;;  %v128_v47 = vadd.f32 %v120_v43, %v93_v42 }
0x16f9   :  { %v302_v55 = vadd.f32 %v301_v51, %v300_v46  ;;  %v305_v5 = vadd.f32 %v297_v60, %v270_v53 }
0x16fa   :  { %v129_v48 = vadd.f32 %v127_v38, %v100_v45 }
0x16fb   :  { %v303_v61 = vrot.slane %v302_v55, 1 }
0x16fc   :  { %v218_v52 = vcombine.low %v128_v47, %v129_v48 }
0x16fd   :  { %v304_v63 = vadd.f32 %v303_v61, %v302_v55 }
0x16fe   :  { %v225_v57 = vrot.slane %v218_v52, %v1428_v24 }
0x16ff   :  { %v306_v1 = vadd.f32 %v304_v63, %v277_v58 }
0x1700   :  { %v232_v62 = vrot.slane %v225_v57, %v1428_v24 }
0x1701   :  { %v393_v12 = vcombine.low %v305_v5, %v306_v1 }
0x1702   :  { %v234_v6 = vmul.f32 %v1362_v10, %v232_v62 }
0x1703   :  { %v400_v7 = vrot.slane %v393_v12, %v1428_v24 }
0x1704   :  { %235 = vst.msk [vmem:[#allocation4] ss:$2 sm:$0x3] %vm1346_vm0, %v234_v6 }
0x1705   :  { %v407_v13 = vrot.slane %v400_v7, %v1428_v24 }
0x1707   :  { %v409_v14 = vmul.f32 %v1376_v15, %v407_v13 }
0x1709   :  { %411 = vst.msk [vmem:[#allocation4 + $0x1] ss:$2 sm:$0x3] %vm1346_vm0, %v409_v14 }
0x1710   :  { %v1183_v16 = vld.sshfl [vmem:[#allocation4] sm:$0x33 pattern:$0x76325410] }
0x1711   :  { %v1069_v17 = vcombine.high %v1183_v16, %v1183_v16  ;;  %v1072_v18 = vsel %vm86_vm3, %v1183_v16, 0.0 }
0x1713   :  { %v1073_v10 = vsel %vm86_vm3, %v1069_v17, 0.0 }
0x1714   :  { %v1074_v19 = vadd.f32 %v1073_v10, %v1072_v18 }
0x1716   :  { %1075 = vadd.xlane.f32.xlu0 %v1074_v19 }
0x177f   :  { %v1018_v20 = vpop.xlane.xlu0 %1017 }
0x1780   :  { %vm1019_vm2 = vcmp.lt.f32.partialorder %v1018_v20, %v1700_v33 }
0x1781   :  { %v1020_v21 = vsel %vm1019_vm2, %v1788_v59, %v1785_v56  ;;  %v1219_v56 = vld [vmem:[#allocation3] sm:$0xf] }
0x1782   :  { %v1021_v24 = vadd.s32 1, %v1020_v21 }
0x1784   :  { %vm1022_vm7 = vcmp.lt.s32.totalorder %v1697_v35, %v1021_v24  ;;  %vm1023_vm8 = vcmp.lt.s32.totalorder %v1703_v8, %v1021_v24 }
0x1785   :  { %vm1024_vm0 = vmand %vm1674_vm4, %vm1022_vm7  ;;  %vm1078_vm4 = vcmp.gt.f32.partialorder %v1453_v39, 0.0 }
0x1786   :  { %vm1025_vm9 = vmand %vm1711_vm10, %vm1023_vm8  ;;  %v1184_v34 = vsel %vm1078_vm4, 1.0, %v1272_v9 }
0x1787   :  { %vm1026_vm11 = vmor %vm877_vm5, %vm1024_vm0  ;;  %vm1085_vm5 = vcmask 1024  }
0x1788   :  { %vm1027_vm12 = vmor %vm878_vm6, %vm1025_vm9  ;;  %v1181_v4 = vsel %vm1026_vm11, 1.0, %v1272_v9 }
0x1789   :  { %v1182_v15 = vsel %vm1027_vm12, 1.0, %v1272_v9 }
0x178a   :  { %v1034_v35 = vcombine.low %v1181_v4, %v1182_v15 }
0x178c   :  { %v1041_v33 = vrot.slane %v1034_v35, %v1398_v40 }
0x178e   :  { %v1043_v8 = vadd.f32 %v1218_v23, %v1041_v33 }
0x1790   :  { %v1044_v0 = vmul.f32 %v1219_v56, %v1043_v8 }
0x1792   :  { %v1052_v59 = vrot.slane %v1044_v0, %v1398_v40 }
0x1794   :  { %v1053_v22 = vcombine.high %v1052_v59, %v1052_v59  ;;  %v1056_v30 = vsel %vm86_vm3, %v1052_v59, 0.0 }
0x1796   :  { %v1057_v25 = vsel %vm86_vm3, %v1053_v22, 0.0 }
0x1797   :  { %v1058_v31 = vadd.f32 %v1057_v25, %v1056_v30 }
0x1799   :  { %1059 = vadd.xlane.f32.xlu1 %v1058_v31 }
0x17a3   :  { %v1076_v26 = vpop.xlane.xlu0 %1075 }
0x1826   :  { %v1060_v27 = vpop.xlane.xlu1 %1059 }
0x1827   :  { %v1077_v3 = vadd.f32 %v1076_v26, %v1060_v27 }
0x1829   :  { %v1082_v28 = vmul.f32 %v1184_v34, %v1077_v3 }
0x182b   :  { %v1084_v40 = vmul.f32 %v1217_v29, %v1082_v28 }
0x182d   :  { %1086 = vst.msk [vmem:[%s1854_s5] sm:$0x3] %vm1085_vm5, %v1084_v40 }
0x182e   :  { %1091 = vsyncpa [#allocation6], 1 }
0x182f   :  { %1092 = vsyncpa [#allocation8], 1 }

</bundles_post_ra>
